<compile_context>
chip_gen: v7x
topology: tpu7x:2x2x1
jax: 0.10.0
libtpu: 0.0.40
codegen_flags: <defaults>
</compile_context>

<pallas_src>
import functools

import jax
import jax.numpy as jnp
import numpy as np
from jax.experimental import pallas as pl
from jax.experimental.pallas import tpu as pltpu

BN_EPS = 1e-5


def _bn_train(y, gamma, beta):
    """BatchNorm1d in training mode: per-(chunk)batch statistics, biased var."""
    mean = jnp.mean(y, axis=0, keepdims=True)
    var = jnp.mean((y - mean) ** 2, axis=0, keepdims=True)
    return (y - mean) * jax.lax.rsqrt(var + BN_EPS) * gamma + beta


def fuzzy_ui_kernel(x_ref, consts_ref, sel_ref, params_ref, out_ref, *,
                    tile_b, chunks):
    # ---- loop-invariant constants: load / unpack ONCE per grid step ----
    consts = consts_ref[...]                       # [2, R*D]
    centers_flat = consts[0:1, :]                  # [1, R*D]
    neg_inv_2s2 = consts[1:2, :]                   # [1, R*D]  == -1/(2*s^2)
    sel = sel_ref[...]                             # [R*D, R]  block-diag 1/D
    params = params_ref[...].astype(jnp.float32)   # [9, R]
    R = sel.shape[1]

    kan_w = params[0:1, :]
    kan_b = params[1:2, :]
    bn1_g = params[2:3, :]
    bn1_b = params[3:4, :]
    bn2_g = params[4:5, :]
    bn2_b = params[5:6, :]
    lin_w = params[6:7, :]                         # [1, R]
    lin_b = params[7:8, 0:1]                       # scalar as [1, 1]
    out_scale = params[8:9, 0:1]                   # scalar (2.75) as [1, 1]

    # ---- per-BN-chunk pipeline (static unroll over C chunks per grid step;
    #      each chunk is exactly tile_b rows, preserving BN semantics) ----
    for c in range(chunks):
        x = x_ref[c * tile_b:(c + 1) * tile_b, :].astype(jnp.float32)  # [TB, D]

        # Lane-pack the rule axis: [TB, R*D] so the VPU/EUP run on full
        # 128-lane vregs instead of 32/128-utilized ones.
        x_t = jnp.concatenate([x] * R, axis=1)            # [TB, R*D]
        diff = x_t - centers_flat
        e = jnp.exp(diff * diff * neg_inv_2s2)            # [TB, R*D]  EUP hot path

        # One MXU selector matmul replaces 8 XLU lane-reductions + concat.
        memb = jnp.dot(e, sel, preferred_element_type=jnp.float32)     # [TB, R]

        # per-rule KAN (approx): w * silu(m) + b
        y = kan_w * (memb * jax.nn.sigmoid(memb)) + kan_b
        # self.batch_norm (train-mode batch stats over exactly tile_b rows)
        y = _bn_train(y, bn1_g, bn1_b)
        # defuzzifier: BatchNorm1d -> Linear(R, 1) -> Sigmoid, then * self.scale
        y = _bn_train(y, bn2_g, bn2_b)

        # Linear(R, 1) producing a LANE-DENSE row: weight, transpose the small
        # [TB, R] tile to [R, TB], reduce over sublanes -> [1, TB].
        wy_t = jnp.transpose(y * lin_w)                   # [R, TB]
        z_row = jnp.sum(wy_t, axis=0, keepdims=True) + lin_b    # [1, TB]
        sim_row = jax.nn.sigmoid(z_row) * out_scale             # [1, TB]

        out_ref[0, c:c + 1, :] = sim_row.astype(out_ref.dtype)  # lane-dense store


def fuzzy_ui_forward(x, consts, sel, params, *, tile_b, chunks_per_step=1):
    N, D = x.shape
    RD, R = sel.shape
    assert RD == R * D
    C = chunks_per_step
    assert N % (tile_b * C) == 0, "demo requires n_edges % (batch_size*C) == 0"
    num_chunks = N // tile_b
    num_steps = num_chunks // C

    kernel = functools.partial(fuzzy_ui_kernel, tile_b=tile_b, chunks=C)

    # EUP-(transcendental)-dominated kernel: tell XLA so it schedules around it.
    flops = N * (3 * RD + 2 * RD * R + 16 * R + 8)
    transcendentals = N * RD + N * R + N
    bytes_accessed = 4 * (N * D + N + 2 * RD + RD * R + 9 * R)
    cost = pl.CostEstimate(flops=int(flops),
                           transcendentals=int(transcendentals),
                           bytes_accessed=int(bytes_accessed))

    out3d = pl.pallas_call(
        kernel,
        out_shape=jax.ShapeDtypeStruct((num_steps, C, tile_b), jnp.float32),
        grid_spec=pltpu.PrefetchScalarGridSpec(
            num_scalar_prefetch=0,
            grid=(num_steps,),
            in_specs=[
                pl.BlockSpec((C * tile_b, D), lambda i: (i, 0)),   # x tile
                pl.BlockSpec((2, RD), lambda i: (0, 0)),           # centers / -1/(2s^2) (resident)
                pl.BlockSpec((RD, R), lambda i: (0, 0)),           # selector matrix (resident)
                pl.BlockSpec((9, R), lambda i: (0, 0)),            # packed per-rule params
            ],
            out_specs=pl.BlockSpec((1, C, tile_b), lambda i: (i, 0, 0)),
        ),
        compiler_params=pltpu.CompilerParams(
            dimension_semantics=("parallel",)),
        cost_estimate=cost,
    )(x, consts, sel, params)
    return out3d.reshape(N, 1)


def pack_constants(centers, scales):
    """Host-side packing: lane-dense [2, R*D] constants and [R*D, R] selector."""
    R, D = centers.shape
    RD = R * D
    centers_flat = centers.reshape(1, RD).astype(jnp.float32)
    neg_inv_2s2 = (-0.5 / (scales * scales)).reshape(1, RD).astype(jnp.float32)
    consts = jnp.concatenate([centers_flat, neg_inv_2s2], axis=0)     # [2, RD]
    sel = ((jnp.arange(RD)[:, None] // D) ==
           jnp.arange(R)[None, :]).astype(jnp.float32) / D            # [RD, R]
    return consts, sel


def fuzzy_ui_reference(x, centers, scales, params, *, tile_b):
    """Pure-JAX reference mirroring the PyTorch chunked forward."""
    N, D = x.shape
    kan_w, kan_b = params[0], params[1]
    bn1_g, bn1_b = params[2], params[3]
    bn2_g, bn2_b = params[4], params[5]
    lin_w = params[6]
    lin_b = params[7, 0]
    out_scale = params[8, 0]
    outs = []
    for s in range(0, N, tile_b):
        xb = x[s:s + tile_b]
        diff = xb[:, None, :] - centers[None, :, :]
        memb = jnp.sum(jnp.exp(-diff ** 2 / (2.0 * scales[None] ** 2)), axis=2) / D
        y = kan_w[None] * (memb * jax.nn.sigmoid(memb)) + kan_b[None]
        y = _bn_train(y, bn1_g[None], bn1_b[None])
        y = _bn_train(y, bn2_g[None], bn2_b[None])
        z = y @ lin_w[:, None] + lin_b
        outs.append(jax.nn.sigmoid(z) * out_scale)
    return jnp.concatenate(outs, axis=0)


def init_params(key, dim, num_rules):
    """Deterministic synthetic init mirroring the module's __init__ shapes."""
    k_c, k_s, k_kw, k_kb, k_lw, k_lb = jax.random.split(key, 6)
    R, D = num_rules, dim
    # centers: xavier_uniform((R, D))
    bound_c = np.sqrt(6.0 / (R + D))
    centers = jax.random.uniform(k_c, (R, D), jnp.float32, -bound_c, bound_c)
    # scales: uniform(1, 2)
    scales = jax.random.uniform(k_s, (R, D), jnp.float32, 1.0, 2.0)
    # per-rule KAN (1->1) weights/bias (approx, see TODO)
    kan_w = jax.random.uniform(k_kw, (R,), jnp.float32, -1.0, 1.0)
    kan_b = jax.random.uniform(k_kb, (R,), jnp.float32, -1.0, 1.0)
    # BatchNorm1d defaults: gamma=1, beta=0
    bn1_g = jnp.ones((R,), jnp.float32)
    bn1_b = jnp.zeros((R,), jnp.float32)
    bn2_g = jnp.ones((R,), jnp.float32)
    bn2_b = jnp.zeros((R,), jnp.float32)
    # defuzzifier Linear(R, 1): kaiming_uniform(a=sqrt(5)) -> bound = 1/sqrt(R)
    bnd = 1.0 / np.sqrt(R)
    lin_w = jax.random.uniform(k_lw, (R,), jnp.float32, -bnd, bnd)
    lin_b = jax.random.uniform(k_lb, (), jnp.float32, -bnd, bnd)
    out_scale = jnp.float32(2.75)

    params = jnp.stack([
        kan_w, kan_b, bn1_g, bn1_b, bn2_g, bn2_b, lin_w,
        jnp.full((R,), lin_b, jnp.float32),
        jnp.full((R,), out_scale, jnp.float32),
    ], axis=0)                                      # [9, R]
    return centers, scales, params


if __name__ == "__main__":
    N_EDGES = 256     # n_edges
    DIM = 32          # dim
    NUM_RULES = 8     # num_rules
    TILE_B = 128      # batch_size (per-chunk size == BN statistics width)

    key = jax.random.PRNGKey(0)
    k_x, k_p = jax.random.split(key)
    x = jax.random.normal(k_x, (N_EDGES, DIM), jnp.float32)
    centers, scales, params = init_params(k_p, DIM, NUM_RULES)
    consts, sel = pack_constants(centers, scales)

    ref = fuzzy_ui_reference(x, centers, scales, params, tile_b=TILE_B)

    # 1 BN chunk per grid step (grid of 2 -> feeds both v7x TensorCores).
    run1 = jax.jit(functools.partial(fuzzy_ui_forward, tile_b=TILE_B,
                                     chunks_per_step=1))
    out1 = jax.block_until_ready(run1(x, consts, sel, params))
    np.testing.assert_allclose(np.asarray(out1), np.asarray(ref),
                               rtol=1e-4, atol=1e-4)

    # 2 BN chunks per grid step (amortizes per-step overhead; BN width unchanged).
    run2 = jax.jit(functools.partial(fuzzy_ui_forward, tile_b=TILE_B,
                                     chunks_per_step=2))
    out2 = jax.block_until_ready(run2(x, consts, sel, params))
    np.testing.assert_allclose(np.asarray(out2), np.asarray(ref),
                               rtol=1e-4, atol=1e-4)

    assert out1.shape == (N_EDGES, 1) and out2.shape == (N_EDGES, 1)
    print("KERNEL_OK")
</pallas_src>

<mosaic_0001>
module attributes {stable_mosaic.version = 11 : i64} {
  func.func @fuzzy_ui_kernel(%arg0: i32, %arg1: memref<128x32xf32, #tpu.memory_space<vmem>>, %arg2: memref<2x256xf32, #tpu.memory_space<vmem>>, %arg3: memref<256x8xf32, #tpu.memory_space<vmem>>, %arg4: memref<9x8xf32, #tpu.memory_space<vmem>>, %arg5: memref<1x1x128xf32, #tpu.memory_space<vmem>>) attributes {dimension_semantics = [#tpu.dimension_semantics<parallel>], iteration_bounds = array<i64: 2>, scalar_prefetch = 0 : i64, scratch_operands = 0 : i64, tpu.core_type = #tpu.core_type<tc>, window_params = [{transform_indices = @transform_0, window_bounds = array<i64: 128, 32>}, {pipeline_mode = #tpu.pipeline_mode<synchronous>, transform_indices = @transform_1, window_bounds = array<i64: 2, 256>}, {pipeline_mode = #tpu.pipeline_mode<synchronous>, transform_indices = @transform_2, window_bounds = array<i64: 256, 8>}, {pipeline_mode = #tpu.pipeline_mode<synchronous>, transform_indices = @transform_3, window_bounds = array<i64: 9, 8>}, {transform_indices = @transform_4, window_bounds = array<i64: 1, 1, 128>}]} {
    %c0 = arith.constant 0 : index
    %c0_0 = arith.constant 0 : index
    %0 = vector.load %arg2[%c0, %c0_0] : memref<2x256xf32, #tpu.memory_space<vmem>>, vector<2x256xf32>
    %1 = vector.extract_strided_slice %0 {offsets = [0, 0], sizes = [1, 256], strides = [1, 1]} : vector<2x256xf32> to vector<1x256xf32>
    %2 = vector.extract_strided_slice %0 {offsets = [1, 0], sizes = [1, 256], strides = [1, 1]} : vector<2x256xf32> to vector<1x256xf32>
    %c0_1 = arith.constant 0 : index
    %c0_2 = arith.constant 0 : index
    %3 = vector.load %arg3[%c0_1, %c0_2] : memref<256x8xf32, #tpu.memory_space<vmem>>, vector<256x8xf32>
    %c0_3 = arith.constant 0 : index
    %c0_4 = arith.constant 0 : index
    %4 = vector.load %arg4[%c0_3, %c0_4] : memref<9x8xf32, #tpu.memory_space<vmem>>, vector<9x8xf32>
    %5 = vector.extract_strided_slice %4 {offsets = [0, 0], sizes = [1, 8], strides = [1, 1]} : vector<9x8xf32> to vector<1x8xf32>
    %6 = vector.extract_strided_slice %4 {offsets = [1, 0], sizes = [1, 8], strides = [1, 1]} : vector<9x8xf32> to vector<1x8xf32>
    %7 = vector.extract_strided_slice %4 {offsets = [2, 0], sizes = [1, 8], strides = [1, 1]} : vector<9x8xf32> to vector<1x8xf32>
    %8 = vector.extract_strided_slice %4 {offsets = [3, 0], sizes = [1, 8], strides = [1, 1]} : vector<9x8xf32> to vector<1x8xf32>
    %9 = vector.extract_strided_slice %4 {offsets = [4, 0], sizes = [1, 8], strides = [1, 1]} : vector<9x8xf32> to vector<1x8xf32>
    %10 = vector.extract_strided_slice %4 {offsets = [5, 0], sizes = [1, 8], strides = [1, 1]} : vector<9x8xf32> to vector<1x8xf32>
    %11 = vector.extract_strided_slice %4 {offsets = [6, 0], sizes = [1, 8], strides = [1, 1]} : vector<9x8xf32> to vector<1x8xf32>
    %12 = vector.extract_strided_slice %4 {offsets = [7, 0], sizes = [1, 1], strides = [1, 1]} : vector<9x8xf32> to vector<1x1xf32>
    %13 = vector.extract_strided_slice %4 {offsets = [8, 0], sizes = [1, 1], strides = [1, 1]} : vector<9x8xf32> to vector<1x1xf32>
    %c0_5 = arith.constant 0 : index
    %c0_6 = arith.constant 0 : index
    %14 = vector.load %arg1[%c0_5, %c0_6] : memref<128x32xf32, #tpu.memory_space<vmem>>, vector<128x32xf32>
    %15 = tpu.concatenate %14, %14, %14, %14, %14, %14, %14, %14 in 1 : vector<128x32xf32>, vector<128x32xf32>, vector<128x32xf32>, vector<128x32xf32>, vector<128x32xf32>, vector<128x32xf32>, vector<128x32xf32>, vector<128x32xf32> -> vector<128x256xf32>
    %16 = vector.broadcast %1 : vector<1x256xf32> to vector<128x256xf32>
    %17 = arith.subf %15, %16 : vector<128x256xf32>
    %18 = arith.mulf %17, %17 : vector<128x256xf32>
    %19 = vector.broadcast %2 : vector<1x256xf32> to vector<128x256xf32>
    %20 = arith.mulf %18, %19 : vector<128x256xf32>
    %21 = math.exp %20 : vector<128x256xf32>
    %cst = arith.constant dense<0.000000e+00> : vector<128x8xf32>
    %22 = tpu.matmul %21, %3, %cst {dimension_numbers = #tpu.dot_dimension_numbers<[1], [0], [0], [1], [0, 0, 1, 1], [], []>} : vector<128x256xf32>, vector<256x8xf32>, vector<128x8xf32> -> vector<128x8xf32>
    %23 = arith.negf %22 : vector<128x8xf32>
    %24 = math.exp %23 : vector<128x8xf32>
    %cst_7 = arith.constant 1.000000e+00 : f32
    %25 = vector.broadcast %cst_7 : f32 to vector<128x8xf32>
    %26 = arith.addf %25, %24 : vector<128x8xf32>
    %27 = arith.divf %25, %26 : vector<128x8xf32>
    %28 = arith.mulf %22, %27 : vector<128x8xf32>
    %29 = vector.broadcast %5 : vector<1x8xf32> to vector<128x8xf32>
    %30 = arith.mulf %29, %28 : vector<128x8xf32>
    %31 = vector.broadcast %6 : vector<1x8xf32> to vector<128x8xf32>
    %32 = arith.addf %30, %31 : vector<128x8xf32>
    %cst_8 = arith.constant dense<0.000000e+00> : vector<8xf32>
    %33 = vector.multi_reduction <add>, %32, %cst_8 [0] : vector<128x8xf32> to vector<8xf32>
    %34 = vector.shape_cast %33 : vector<8xf32> to vector<1x8xf32>
    %cst_9 = arith.constant 1.280000e+02 : f32
    %35 = vector.broadcast %cst_9 : f32 to vector<1x8xf32>
    %36 = arith.divf %34, %35 : vector<1x8xf32>
    %37 = vector.broadcast %36 : vector<1x8xf32> to vector<128x8xf32>
    %38 = arith.subf %32, %37 : vector<128x8xf32>
    %39 = arith.mulf %38, %38 : vector<128x8xf32>
    %cst_10 = arith.constant dense<0.000000e+00> : vector<8xf32>
    %40 = vector.multi_reduction <add>, %39, %cst_10 [0] : vector<128x8xf32> to vector<8xf32>
    %41 = vector.shape_cast %40 : vector<8xf32> to vector<1x8xf32>
    %cst_11 = arith.constant 1.280000e+02 : f32
    %42 = vector.broadcast %cst_11 : f32 to vector<1x8xf32>
    %43 = arith.divf %41, %42 : vector<1x8xf32>
    %44 = vector.broadcast %36 : vector<1x8xf32> to vector<128x8xf32>
    %45 = arith.subf %32, %44 : vector<128x8xf32>
    %cst_12 = arith.constant 9.99999974E-6 : f32
    %46 = vector.broadcast %cst_12 : f32 to vector<1x8xf32>
    %47 = arith.addf %43, %46 : vector<1x8xf32>
    %48 = math.rsqrt %47 : vector<1x8xf32>
    %49 = vector.broadcast %48 : vector<1x8xf32> to vector<128x8xf32>
    %50 = arith.mulf %45, %49 : vector<128x8xf32>
    %51 = vector.broadcast %7 : vector<1x8xf32> to vector<128x8xf32>
    %52 = arith.mulf %50, %51 : vector<128x8xf32>
    %53 = vector.broadcast %8 : vector<1x8xf32> to vector<128x8xf32>
    %54 = arith.addf %52, %53 : vector<128x8xf32>
    %cst_13 = arith.constant dense<0.000000e+00> : vector<8xf32>
    %55 = vector.multi_reduction <add>, %54, %cst_13 [0] : vector<128x8xf32> to vector<8xf32>
    %56 = vector.shape_cast %55 : vector<8xf32> to vector<1x8xf32>
    %cst_14 = arith.constant 1.280000e+02 : f32
    %57 = vector.broadcast %cst_14 : f32 to vector<1x8xf32>
    %58 = arith.divf %56, %57 : vector<1x8xf32>
    %59 = vector.broadcast %58 : vector<1x8xf32> to vector<128x8xf32>
    %60 = arith.subf %54, %59 : vector<128x8xf32>
    %61 = arith.mulf %60, %60 : vector<128x8xf32>
    %cst_15 = arith.constant dense<0.000000e+00> : vector<8xf32>
    %62 = vector.multi_reduction <add>, %61, %cst_15 [0] : vector<128x8xf32> to vector<8xf32>
    %63 = vector.shape_cast %62 : vector<8xf32> to vector<1x8xf32>
    %cst_16 = arith.constant 1.280000e+02 : f32
    %64 = vector.broadcast %cst_16 : f32 to vector<1x8xf32>
    %65 = arith.divf %63, %64 : vector<1x8xf32>
    %66 = vector.broadcast %58 : vector<1x8xf32> to vector<128x8xf32>
    %67 = arith.subf %54, %66 : vector<128x8xf32>
    %cst_17 = arith.constant 9.99999974E-6 : f32
    %68 = vector.broadcast %cst_17 : f32 to vector<1x8xf32>
    %69 = arith.addf %65, %68 : vector<1x8xf32>
    %70 = math.rsqrt %69 : vector<1x8xf32>
    %71 = vector.broadcast %70 : vector<1x8xf32> to vector<128x8xf32>
    %72 = arith.mulf %67, %71 : vector<128x8xf32>
    %73 = vector.broadcast %9 : vector<1x8xf32> to vector<128x8xf32>
    %74 = arith.mulf %72, %73 : vector<128x8xf32>
    %75 = vector.broadcast %10 : vector<1x8xf32> to vector<128x8xf32>
    %76 = arith.addf %74, %75 : vector<128x8xf32>
    %77 = vector.broadcast %11 : vector<1x8xf32> to vector<128x8xf32>
    %78 = arith.mulf %76, %77 : vector<128x8xf32>
    %79 = tpu.transpose %78, [1, 0] : vector<128x8xf32> -> vector<8x128xf32>
    %cst_18 = arith.constant dense<0.000000e+00> : vector<128xf32>
    %80 = vector.multi_reduction <add>, %79, %cst_18 [0] : vector<8x128xf32> to vector<128xf32>
    %81 = vector.shape_cast %80 : vector<128xf32> to vector<1x128xf32>
    %82 = vector.broadcast %12 : vector<1x1xf32> to vector<1x128xf32>
    %83 = arith.addf %81, %82 : vector<1x128xf32>
    %84 = arith.negf %83 : vector<1x128xf32>
    %85 = math.exp %84 : vector<1x128xf32>
    %cst_19 = arith.constant 1.000000e+00 : f32
    %86 = vector.broadcast %cst_19 : f32 to vector<1x128xf32>
    %87 = arith.addf %86, %85 : vector<1x128xf32>
    %88 = arith.divf %86, %87 : vector<1x128xf32>
    %89 = vector.broadcast %13 : vector<1x1xf32> to vector<1x128xf32>
    %90 = arith.mulf %88, %89 : vector<1x128xf32>
    %c0_20 = arith.constant 0 : index
    %c0_21 = arith.constant 0 : index
    %c0_22 = arith.constant 0 : index
    %91 = vector.load %arg5[%c0_20, %c0_21, %c0_22] : memref<1x1x128xf32, #tpu.memory_space<vmem>>, vector<1x1x128xf32>
    %92 = vector.shape_cast %91 : vector<1x1x128xf32> to vector<1x128xf32>
    %93 = vector.shape_cast %90 : vector<1x128xf32> to vector<1x1x128xf32>
    tpu.vector_store %arg5[%c0_20, %c0_21, %c0_22], %93 {strides = array<i32>} : memref<1x1x128xf32, #tpu.memory_space<vmem>>, vector<1x1x128xf32>,
    return
  }
  func.func @transform_0(%arg0: i32) -> (i32, i32) {
    %c0_i32 = arith.constant 0 : i32
    %c0_i32_0 = arith.constant 0 : i32
    return %arg0, %c0_i32 : i32, i32
  }
  func.func @transform_1(%arg0: i32) -> (i32, i32) {
    %c0_i32 = arith.constant 0 : i32
    %c0_i32_0 = arith.constant 0 : i32
    %c0_i32_1 = arith.constant 0 : i32
    return %c0_i32, %c0_i32_0 : i32, i32
  }
  func.func @transform_2(%arg0: i32) -> (i32, i32) {
    %c0_i32 = arith.constant 0 : i32
    %c0_i32_0 = arith.constant 0 : i32
    %c0_i32_1 = arith.constant 0 : i32
    return %c0_i32, %c0_i32_0 : i32, i32
  }
  func.func @transform_3(%arg0: i32) -> (i32, i32) {
    %c0_i32 = arith.constant 0 : i32
    %c0_i32_0 = arith.constant 0 : i32
    %c0_i32_1 = arith.constant 0 : i32
    return %c0_i32, %c0_i32_0 : i32, i32
  }
  func.func @transform_4(%arg0: i32) -> (i32, i32, i32) {
    %c0_i32 = arith.constant 0 : i32
    %c0_i32_0 = arith.constant 0 : i32
    %c0_i32_1 = arith.constant 0 : i32
    return %arg0, %c0_i32, %c0_i32_0 : i32, i32, i32
  }
}

</mosaic_0001>

<bundles_post_ra>
// kernel: fuzzy_ui_forward.1
= control target key start
LH: loop header
LB: loop body
LE: loop exit
PB: predicated region body
PF: predicated region fallthrough
CT: control target
= control target key end

     0   :  { %9 = vsyncpa [#allocation3], 0  ;;  %s2802_s0 = inlined_call_operand.vmem [shape: f32[256,32], index: 0, kind: input, shape index: {}]   ;;  %s2803_s1 = inlined_call_operand.vmem [shape: f32[2,256], index: 1, kind: input, shape index: {}]   ;;  %s2804_s2 = inlined_call_operand.vmem [shape: f32[256,8], index: 2, kind: input, shape index: {}]   ;;  %s2805_s3 = inlined_call_operand.vmem [shape: f32[9,8], index: 3, kind: input, shape index: {}]   ;;  %s2806_s4 = inlined_call_operand.hbm [shape: f32[2,1,128], index: 4, kind: output, shape index: {}]  }
   0x1   :  { %11 = vsyncpa [#allocation3 + $0x1], 0  ;;  %s1861_s15 = smov 0   ;;  %s1863_s16 = smov 0  }
   0x2   :  { %s1865_s17 = smov 0   ;;  %s1867_s18 = smov 0  }
   0x3 LB: > { %s1432_s19 = sadd.s32 4294967295, %s1829_s18   ;;  %s1433_s20 = sadd.s32 4294967294, %s1829_s18   ;;  %s1829_s18 = sphi %s1867_s18, %s2812_s18   ;;  %s1825_s17 = sphi %s1865_s17, %s2811_s17   ;;  %s1821_s16 = sphi %s1863_s16, %s2810_s16   ;;  %s1817_s15 = sphi %s1861_s15, %s2809_s15  }
   0x4   : > { %s1884_s21 = sadd.s32 1, %s1829_s18   ;;  %s113_s22 = sadd.s32 1, %s1825_s17 }
   0x5   : > { %s110_s23 = ssub.s32 %s1829_s18, %s1884_s21  ;;  %p123_p0 = scmp.ne.s32.totalorder %s1825_s17, %s1821_s16 }
   0x6   : > { %p111_p1 = scmp.eq.s32.totalorder %s110_s23, 0  ;;  %p124_p2 = scmp.eq.s32.totalorder %s1432_s19, 1 }
   0x7   : > { %p129_p3 = scmp.ne.s32.totalorder %s1821_s16, %s1817_s15  ;;  %p130_p4 = scmp.eq.s32.totalorder %s1433_s20, 1 }
   0x8   : > { %s1894_s24 = scalar_select %p111_p1, %s1825_s17, %s113_s22  }
   0x9   : > { %p1896_p5 = por %p124_p2, %p123_p0  ;;  %p1900_p6 = por %p130_p4, %p129_p3 }
   0xa   : > { %p1436_p7 = scmp.ge.s32.totalorder %s1829_s18, 1  ;;  %p166_p8 = scmp.lt.s32.totalorder %s1829_s18, 3 }
   0xc   : > { %p167_p9 = pnand %p1436_p7, %p166_p8 }
   0xd   : > { %s1906_s27 = sshll.u32 (!%p167_p9), %s1432_s19, 4  ;;  %v214_v0 = vld [vmem:[%s2804_s2 + $0x80] sm:$0xff] (!%p167_p9)  ;;  %v215_v1 = vld [vmem:[%s2804_s2 + $0x88] sm:$0xff] (!%p167_p9)  ;;  %v216_v5 = vld [vmem:[%s2804_s2 + $0x90] sm:$0xff] (!%p167_p9)  ;;  %s1832_s28 = smov (!%p167_p9), 32   ;;  %vm408_vm0 = vcmask (!%p167_p9), 261120  }
   0xe   : > { %170 = sbr.rel (%p167_p9) target bundleno = 899 (0x383), region = 36  ;;  %v198_v2 = vld [vmem:[%s2804_s2] sm:$0xff] (!%p167_p9)  ;;  %p192_p10 = scmp.lt.s32.totalorder (!%p167_p9), %s1906_s27, 31  ;;  %v1539_v3 = vpack.c.bf16 (!%p167_p9), %v215_v1, %v214_v0  ;;  %v199_v4 = vld [vmem:[%s2804_s2 + $0x8] sm:$0xff] (!%p167_p9)  ;;  %v217_v6 = vld [vmem:[%s2804_s2 + $0x98] sm:$0xff] (!%p167_p9)  ;;  %v460_v0 = vlaneseq (!%p167_p9)  ;;  %vm425_vm1 = vcmask (!%p167_p9), 523264  }
   0xf   : > { %v1541_v7 = vpack.c.bf16 (!%p167_p9), %v199_v4, %v198_v2  ;;  %v1543_v8 = vpack.c.bf16 (!%p167_p9), %v217_v6, %v216_v5  ;;  %v200_v9 = vld [vmem:[%s2804_s2 + $0x10] sm:$0xff] (!%p167_p9)  ;;  %v201_v10 = vld [vmem:[%s2804_s2 + $0x18] sm:$0xff] (!%p167_p9)  ;;  %v218_v11 = vld [vmem:[%s2804_s2 + $0xa0] sm:$0xff] (!%p167_p9)  ;;  %s1833_s12 = smov (!%p167_p9), 64   ;;  %vm442_vm2 = vcmask (!%p167_p9), 785408   ;;  %vm953_vm3 = vcmask (!%p167_p9), 64512   ;;  %s2760_s7 = scalar_lea.hbm (!%p167_p9), %s2806_s4, %s1906_s27 }
  0x10   : > { %1540 = vmatprep.subr.bf16.mxu0 (!%p167_p9), %v1539_v3  ;;  %v219_v12 = vld [vmem:[%s2804_s2 + $0xa8] sm:$0xff] (!%p167_p9)  ;;  %1571 = vmatprep.subr.bf16.mxu1 (!%p167_p9), %v1539_v3  ;;  %v1545_v13 = vpack.c.bf16 (!%p167_p9), %v201_v10, %v200_v9  ;;  %v202_v15 = vld [vmem:[%s2804_s2 + $0x20] sm:$0xff] (!%p167_p9)  ;;  %v220_v18 = vld [vmem:[%s2804_s2 + $0xb0] sm:$0xff] (!%p167_p9)  ;;  %v2155_v1 = vshrl.u32 (!%p167_p9), %v460_v0, 7  ;;  %s189_s22 = sand.u32 (!%p167_p9), 1, %s1821_s16   ;;  %s1835_s11 = smov (!%p167_p9), [#allocation2]  }
  0x11   : > { %1542 = vmatpush3.bf16.msra.mxu0 (!%p167_p9), %v1541_v7  ;;  %1579 = vmatpush3.bf16.msra.mxu1 (!%p167_p9), %v1541_v7  ;;  %v1547_v14 = vpack.c.bf16 (!%p167_p9), %v219_v12, %v218_v11  ;;  %v203_v16 = vld [vmem:[%s2804_s2 + $0x28] sm:$0xff] (!%p167_p9)  ;;  %v221_v19 = vld [vmem:[%s2804_s2 + $0xb8] sm:$0xff] (!%p167_p9)  ;;  %v204_v23 = vld [vmem:[%s2804_s2 + $0x30] sm:$0xff] (!%p167_p9)  ;;  %s190_s29 = scalar_lea.vmem (!%p167_p9), [#allocation2], %s189_s22  ;;  %s1366_s8 = scalar_lea.sflag (!%p167_p9), [#allocation3], %s189_s22 }
  0x12   : > { %1544 = vmatprep.subr.bf16.mxu0 (!%p167_p9), %v1543_v8  ;;  %1572 = vmatprep.subr.bf16.mxu1 (!%p167_p9), %v1543_v8  ;;  %v1549_v21 = vpack.c.bf16 (!%p167_p9), %v203_v16, %v202_v15  ;;  %v1551_v22 = vpack.c.bf16 (!%p167_p9), %v221_v19, %v220_v18  ;;  %v205_v24 = vld [vmem:[%s2804_s2 + $0x38] sm:$0xff] (!%p167_p9)  ;;  %v222_v25 = vld [vmem:[%s2804_s2 + $0xc0] sm:$0xff] (!%p167_p9)  ;;  %v223_v26 = vld [vmem:[%s2804_s2 + $0xc8] sm:$0xff] (!%p167_p9)  ;;  %v2158_v2 = vsub.s32 (!%p167_p9), 0, %v2155_v1  ;;  %v466_v3 = vsub.s32 (!%p167_p9), 2, %v2155_v1  ;;  %s1378_s30 = sshll.u32 (!%p167_p9), %s190_s29, 4  ;;  %s2762_s30 = int_to_ptr.vmem [resolvable:$true] %s1378_s30 }
  0x13   : > { %v1553_v27 = vpack.c.bf16 (!%p167_p9), %v205_v24, %v204_v23  ;;  %v1555_v28 = vpack.c.bf16 (!%p167_p9), %v223_v26, %v222_v25  ;;  %v206_v29 = vld [vmem:[%s2804_s2 + $0x40] sm:$0xff] (!%p167_p9)  ;;  %v207_v30 = vld [vmem:[%s2804_s2 + $0x48] sm:$0xff] (!%p167_p9)  ;;  %v224_v31 = vld [vmem:[%s2804_s2 + $0xd0] sm:$0xff] (!%p167_p9)  ;;  %v2168_v7 = vsub.s32 (!%p167_p9), 1, %v2155_v1  ;;  %v548_v8 = vsub.s32 (!%p167_p9), 3, %v2155_v1  ;;  %s1767_s10 = scalar_lea.vmem (!%p167_p9), %s2762_s30, 16 }
  0x14   : > { %v225_v32 = vld [vmem:[%s2804_s2 + $0xd8] sm:$0xff] (!%p167_p9)  ;;  %v1557_v34 = vpack.c.bf16 (!%p167_p9), %v207_v30, %v206_v29  ;;  %v208_v36 = vld [vmem:[%s2804_s2 + $0x50] sm:$0xff] (!%p167_p9)  ;;  %v226_v38 = vld [vmem:[%s2804_s2 + $0xe0] sm:$0xff] (!%p167_p9)  ;;  %p1768_p11 = scmp.ne.s32.totalorder (!%p167_p9), %s2762_s30, %s1767_s10  ;;  %s1771_s13 = sshll.u32 (!%p167_p9), %s1835_s11, 4  ;;  %s1772_s13 = int_to_ptr.vmem [resolvable:$false] %s1771_s13 }
  0x15   : > { %s193_s23 = scalar_select %p192_p10, %s1906_s27, 31  ;;  %1546 = vmatpush3.bf16.msra.mxu0 %v1545_v13  ;;  %1580 = vmatpush3.bf16.msra.mxu1 %v1545_v13  ;;  %v1559_v35 = vpack.c.bf16 %v225_v32, %v224_v31  ;;  %v209_v37 = vld [vmem:[%s2804_s2 + $0x58] sm:$0xff]  ;;  %v227_v39 = vld [vmem:[%s2804_s2 + $0xe8] sm:$0xff]  ;;  %v210_v43 = vld [vmem:[%s2804_s2 + $0x60] sm:$0xff] }
  0x16   : > { %1548 = vmatprep.subr.bf16.mxu0 %v1547_v14  ;;  %1573 = vmatprep.subr.bf16.mxu1 %v1547_v14  ;;  %v1561_v41 = vpack.c.bf16 %v209_v37, %v208_v36  ;;  %v1563_v42 = vpack.c.bf16 %v227_v39, %v226_v38  ;;  %v211_v44 = vld [vmem:[%s2804_s2 + $0x68] sm:$0xff]  ;;  %v228_v45 = vld [vmem:[%s2804_s2 + $0xf0] sm:$0xff]  ;;  %v229_v46 = vld [vmem:[%s2804_s2 + $0xf8] sm:$0xff]  ;;  %p1769_p12 = pnand %p1768_p11, %p1896_p5  ;;  %s1773_s14 = scalar_lea.vmem %s1772_s13, 32 }
  0x17   : > { %s1438_s6 = sshll.u32 %s193_s23, 3  ;;  %s1831_s23 = smov 96   ;;  %v1565_v47 = vpack.c.bf16 %v211_v44, %v210_v43  ;;  %v1567_v48 = vpack.c.bf16 %v229_v46, %v228_v45  ;;  %v212_v49 = vld [vmem:[%s2804_s2 + $0x70] sm:$0xff]  ;;  %v213_v50 = vld [vmem:[%s2804_s2 + $0x78] sm:$0xff]  ;;  %v197_v4 = vld [vmem:[%s2803_s1] sm:$0xf] }
  0x18   : > { %s1943_s9 = scalar_lea.vmem %s2802_s0, %s1438_s6  ;;  %v1569_v53 = vpack.c.bf16 %v213_v50, %v212_v49  ;;  %v463_v5 = vrot.slane %v197_v4, %v2158_v2  ;;  %v467_v6 = vrot.slane %v197_v4, %v466_v3  ;;  %v545_v13 = vrot.slane %v197_v4, %v2168_v7  ;;  %p1770_p13 = pneg %p1769_p12 }
  0x19   : > { %v1952_v17 = vld [vmem:[%s1943_s9] sm:$0xff]  ;;  %v1965_v20 = vld [vmem:[%s1943_s9 + $0x8] sm:$0xff]  ;;  %1550 = vmatpush3.bf16.msra.mxu0 %v1549_v21  ;;  %1581 = vmatpush3.bf16.msra.mxu1 %v1549_v21  ;;  %v2000_v33 = vld [vmem:[%s1943_s9 + $0x10] sm:$0xff]  ;;  %v549_v14 = vrot.slane %v197_v4, %v548_v8  ;;  %p1774_p0 = scmp.lt.s32.totalorder %s2762_s30, %s1772_s13  ;;  %p1775_p1 = scmp.lt.s32.totalorder %s1773_s14, %s1767_s10 }
  0x1a   : > { %360 = vrot.lane.b32.xlu1 %v1952_v17, %s1831_s23  ;;  %264 = vrot.lane.b32.xlu0 %v1952_v17, %s1832_s28  ;;  %v2019_v40 = vld [vmem:[%s1943_s9 + $0x18] sm:$0xff]  ;;  %v2048_v51 = vld [vmem:[%s1943_s9 + $0x40] sm:$0xff]  ;;  %v2172_v11 = vrot.slane %v463_v5, %v2158_v2  ;;  %v2175_v12 = vrot.slane %v467_v6, %v2158_v2 }
  0x1b   : > { %1552 = vmatprep.subr.bf16.mxu0 %v1551_v22  ;;  %1574 = vmatprep.subr.bf16.mxu1 %v1551_v22  ;;  %v2051_v52 = vld [vmem:[%s1943_s9 + $0x20] sm:$0xff]  ;;  %v2066_v54 = vld [vmem:[%s1943_s9 + $0x48] sm:$0xff]  ;;  %v2084_v56 = vld [vmem:[%s1943_s9 + $0x50] sm:$0xff]  ;;  %v2185_v22 = vrot.slane %v545_v13, %v2168_v7  ;;  %v2190_v25 = vrot.slane %v549_v14, %v2168_v7  ;;  %p1776_p2 = por %p1775_p1, %p1774_p0 }
  0x1c   : > { %v2069_v55 = vld [vmem:[%s1943_s9 + $0x28] sm:$0xff]  ;;  %v2087_v57 = vld [vmem:[%s1943_s9 + $0x30] sm:$0xff]  ;;  %v2102_v58 = vld [vmem:[%s1943_s9 + $0x58] sm:$0xff] }
  0x1d   : > { %1554 = vmatpush3.bf16.msra.mxu0 %v1553_v27  ;;  %1582 = vmatpush3.bf16.msra.mxu1 %v1553_v27  ;;  %v2105_v59 = vld [vmem:[%s1943_s9 + $0x38] sm:$0xff]  ;;  %v2120_v60 = vld [vmem:[%s1943_s9 + $0x60] sm:$0xff]  ;;  %v2127_v61 = vld [vmem:[%s1943_s9 + $0x68] sm:$0xff]  ;;  %p1777_p3 = pnand %p1776_p2, %p1770_p13 }
  0x1e   : > { %266 = vrot.lane.b32.xlu1 %v1965_v20, %s1832_s28  ;;  %312 = vrot.lane.b32.xlu0 %v1952_v17, %s1833_s12  ;;  %v2138_v62 = vld [vmem:[%s1943_s9 + $0x70] sm:$0xff]  ;;  %v2145_v63 = vld [vmem:[%s1943_s9 + $0x78] sm:$0xff] }
  0x1f   : > { %1556 = vmatprep.subr.bf16.mxu0 %v1555_v28  ;;  %1575 = vmatprep.subr.bf16.mxu1 %v1555_v28 }
  0x21   : > { %1558 = vmatpush3.bf16.msra.mxu0 %v1557_v34  ;;  %1583 = vmatpush3.bf16.msra.mxu1 %v1557_v34 }
  0x22   : > { %362 = vrot.lane.b32.xlu1 %v1965_v20, %s1831_s23  ;;  %314 = vrot.lane.b32.xlu0 %v1965_v20, %s1833_s12 }
  0x23   : > { %1560 = vmatprep.subr.bf16.mxu0 %v1559_v35  ;;  %1576 = vmatprep.subr.bf16.mxu1 %v1559_v35 }
  0x25   : > { %1562 = vmatpush3.bf16.msra.mxu0 %v1561_v41  ;;  %1584 = vmatpush3.bf16.msra.mxu1 %v1561_v41 }
  0x26   : > { %316 = vrot.lane.b32.xlu1 %v2000_v33, %s1833_s12  ;;  %268 = vrot.lane.b32.xlu0 %v2000_v33, %s1832_s28 }
  0x27   : > { %1564 = vmatprep.subr.bf16.mxu0 %v1563_v42  ;;  %1577 = vmatprep.subr.bf16.mxu1 %v1563_v42 }
  0x29   : > { %1566 = vmatpush3.bf16.msra.mxu0 %v1565_v47  ;;  %1585 = vmatpush3.bf16.msra.mxu1 %v1565_v47 }
  0x2a   : > { %270 = vrot.lane.b32.xlu1 %v2019_v40, %s1832_s28  ;;  %364 = vrot.lane.b32.xlu0 %v2000_v33, %s1831_s23 }
  0x2b   : > { %1568 = vmatprep.subr.bf16.mxu0 %v1567_v48  ;;  %1578 = vmatprep.subr.bf16.mxu1 %v1567_v48 }
  0x2d   : > { %1570 = vmatpush3.bf16.msra.mxu0 %v1569_v53  ;;  %1586 = vmatpush3.bf16.msra.mxu1 %v1569_v53 }
  0x2e   : > { %366 = vrot.lane.b32.xlu1 %v2019_v40, %s1831_s23  ;;  %318 = vrot.lane.b32.xlu0 %v2019_v40, %s1833_s12 }
  0x32   : > { %280 = vrot.lane.b32.xlu1 %v2048_v51, %s1832_s28  ;;  %272 = vrot.lane.b32.xlu0 %v2051_v52, %s1832_s28 }
  0x36   : > { %328 = vrot.lane.b32.xlu1 %v2048_v51, %s1833_s12  ;;  %320 = vrot.lane.b32.xlu0 %v2051_v52, %s1833_s12 }
  0x3a   : > { %376 = vrot.lane.b32.xlu1 %v2048_v51, %s1831_s23  ;;  %368 = vrot.lane.b32.xlu0 %v2051_v52, %s1831_s23 }
  0x3e   : > { %282 = vrot.lane.b32.xlu1 %v2066_v54, %s1832_s28  ;;  %274 = vrot.lane.b32.xlu0 %v2069_v55, %s1832_s28 }
  0x42   : > { %330 = vrot.lane.b32.xlu1 %v2066_v54, %s1833_s12  ;;  %322 = vrot.lane.b32.xlu0 %v2069_v55, %s1833_s12 }
  0x46   : > { %378 = vrot.lane.b32.xlu1 %v2066_v54, %s1831_s23  ;;  %370 = vrot.lane.b32.xlu0 %v2069_v55, %s1831_s23 }
  0x4a   : > { %284 = vrot.lane.b32.xlu1 %v2084_v56, %s1832_s28  ;;  %276 = vrot.lane.b32.xlu0 %v2087_v57, %s1832_s28 }
  0x4e   : > { %332 = vrot.lane.b32.xlu1 %v2084_v56, %s1833_s12  ;;  %324 = vrot.lane.b32.xlu0 %v2087_v57, %s1833_s12 }
  0x52   : > { %380 = vrot.lane.b32.xlu1 %v2084_v56, %s1831_s23  ;;  %372 = vrot.lane.b32.xlu0 %v2087_v57, %s1831_s23 }
  0x56   : > { %286 = vrot.lane.b32.xlu1 %v2102_v58, %s1832_s28  ;;  %278 = vrot.lane.b32.xlu0 %v2105_v59, %s1832_s28 }
  0x5a   : > { %334 = vrot.lane.b32.xlu1 %v2102_v58, %s1833_s12  ;;  %326 = vrot.lane.b32.xlu0 %v2105_v59, %s1833_s12 }
  0x5e   : > { %382 = vrot.lane.b32.xlu1 %v2102_v58, %s1831_s23  ;;  %374 = vrot.lane.b32.xlu0 %v2105_v59, %s1831_s23 }
  0x62   : > { %288 = vrot.lane.b32.xlu0 %v2120_v60, %s1832_s28  ;;  %336 = vrot.lane.b32.xlu1 %v2120_v60, %s1833_s12 }
  0x66   : > { %384 = vrot.lane.b32.xlu0 %v2120_v60, %s1831_s23  ;;  %290 = vrot.lane.b32.xlu1 %v2127_v61, %s1832_s28 }
  0x6a   : > { %338 = vrot.lane.b32.xlu0 %v2127_v61, %s1833_s12  ;;  %386 = vrot.lane.b32.xlu1 %v2127_v61, %s1831_s23 }
  0x6e   : > { %292 = vrot.lane.b32.xlu0 %v2138_v62, %s1832_s28  ;;  %340 = vrot.lane.b32.xlu1 %v2138_v62, %s1833_s12 }
  0x72   : > { %388 = vrot.lane.b32.xlu0 %v2138_v62, %s1831_s23  ;;  %294 = vrot.lane.b32.xlu1 %v2145_v63, %s1832_s28 }
  0x76   : > { %342 = vrot.lane.b32.xlu0 %v2145_v63, %s1833_s12  ;;  %390 = vrot.lane.b32.xlu1 %v2145_v63, %s1831_s23 }
  0x8c   : > { %v361_v9 = vpop.permute.xlu1 %360  ;;  %v265_v10 = vpop.permute.xlu0 %264 }
  0x8d   : > { %v409_v15 = vsel %vm408_vm0, %v1952_v17, %v265_v10 }
  0x90   : > { %v267_v16 = vpop.permute.xlu1 %266  ;;  %v313_v18 = vpop.permute.xlu0 %312 }
  0x91   : > { %v426_v19 = vsel %vm425_vm1, %v409_v15, %v313_v18  ;;  %v410_v26 = vsel %vm408_vm0, %v1965_v20, %v267_v16 }
  0x92   : > { %v443_v21 = vsel %vm442_vm2, %v426_v19, %v361_v9 }
  0x93   : > { %v478_v23 = vsub.f32 %v443_v21, %v2172_v11  ;;  %v479_v24 = vsub.f32 %v443_v21, %v2175_v12 }
  0x94   : > { %v363_v17 = vpop.permute.xlu1 %362  ;;  %v315_v27 = vpop.permute.xlu0 %314 }
  0x95   : > { %v510_v28 = vmul.f32 %v478_v23, %v478_v23  ;;  %v427_v29 = vsel %vm425_vm1, %v410_v26, %v315_v27  ;;  %v511_v30 = vmul.f32 %v479_v24, %v479_v24 }
  0x96   : > { %v444_v31 = vsel %vm442_vm2, %v427_v29, %v363_v17 }
  0x97   : > { %v560_v32 = vmul.f32 %v2185_v22, %v510_v28  ;;  %v480_v34 = vsub.f32 %v444_v31, %v2172_v11  ;;  %v481_v35 = vsub.f32 %v444_v31, %v2175_v12  ;;  %v561_v36 = vmul.f32 %v2190_v25, %v511_v30 }
  0x98   : > { %v317_v37 = vpop.permute.xlu1 %316  ;;  %v269_v38 = vpop.permute.xlu0 %268 }
  0x99   : > { %v592_v39 = vmul.f32 1.442695, %v560_v32  ;;  %v512_v20 = vmul.f32 %v480_v34, %v480_v34  ;;  %v513_v41 = vmul.f32 %v481_v35, %v481_v35  ;;  %v411_v42 = vsel %vm408_vm0, %v2000_v33, %v269_v38 }
  0x9a   : > { %v594_v43 = vmul.f32 1.442695, %v561_v36  ;;  %v428_v47 = vsel %vm425_vm1, %v411_v42, %v317_v37 }
  0x9b   : > { %1631 = vpow2.f32 %v592_v39  ;;  %v562_v44 = vmul.f32 %v2185_v22, %v512_v20  ;;  %v563_v45 = vmul.f32 %v2190_v25, %v513_v41 }
  0x9c   : > { %v271_v46 = vpop.permute.xlu1 %270  ;;  %v365_v48 = vpop.permute.xlu0 %364  ;;  %1633 = vpow2.f32 %v594_v43 }
  0x9d   : > { %v596_v49 = vmul.f32 1.442695, %v562_v44  ;;  %v598_v50 = vmul.f32 1.442695, %v563_v45  ;;  %v445_v53 = vsel %vm442_vm2, %v428_v47, %v365_v48  ;;  %v412_v33 = vsel %vm408_vm0, %v2019_v40, %v271_v46 }
  0x9e   : > { %v482_v0 = vsub.f32 %v445_v53, %v2172_v11  ;;  %v483_v4 = vsub.f32 %v445_v53, %v2175_v12 }
  0x9f   : > { %1635 = vpow2.f32 %v596_v49 }
  0xa0   : > { %1637 = vpow2.f32 %v598_v50  ;;  %v514_v5 = vmul.f32 %v482_v0, %v482_v0  ;;  %v515_v6 = vmul.f32 %v483_v4, %v483_v4  ;;  %v367_v9 = vpop.permute.xlu1 %366  ;;  %v319_v10 = vpop.permute.xlu0 %318 }
  0xa1   : > { %v429_v13 = vsel %vm425_vm1, %v412_v33, %v319_v10 }
  0xa2   : > { %v564_v14 = vmul.f32 %v2185_v22, %v514_v5  ;;  %v565_v15 = vmul.f32 %v2190_v25, %v515_v6  ;;  %v446_v16 = vsel %vm442_vm2, %v429_v13, %v367_v9 }
  0xa3   : > { %v484_v18 = vsub.f32 %v446_v16, %v2172_v11  ;;  %v485_v19 = vsub.f32 %v446_v16, %v2175_v12 }
  0xa4   : > { %v600_v21 = vmul.f32 1.442695, %v564_v14  ;;  %v602_v23 = vmul.f32 1.442695, %v565_v15  ;;  %v281_v24 = vpop.permute.xlu1 %280  ;;  %v273_v40 = vpop.permute.xlu0 %272 }
  0xa5   : > { %v1632_v26 = vpop.eup %1631  ;;  %v516_v17 = vmul.f32 %v484_v18, %v484_v18  ;;  %v517_v27 = vmul.f32 %v485_v19, %v485_v19  ;;  %v417_v38 = vsel %vm408_vm0, %v2048_v51, %v281_v24  ;;  %v413_v39 = vsel %vm408_vm0, %v2051_v52, %v273_v40 }
  0xa6   : > { %v1634_v28 = vpop.eup %1633  ;;  %1639 = vpow2.f32 %v600_v21 }
  0xa7   : > { %1641 = vpow2.f32 %v602_v23  ;;  %v566_v29 = vmul.f32 %v2185_v22, %v516_v17  ;;  %v567_v30 = vmul.f32 %v2190_v25, %v517_v27  ;;  %720 = vmatprep.mubr.f32.mxu0 %v1634_v28 }
  0xa8   : > { %721 = vmatmul.mubr.f32.vlgmr.msra.gmra.mrb[0].mxu0 %v1632_v26  ;;  %v329_v31 = vpop.permute.xlu1 %328  ;;  %v321_v32 = vpop.permute.xlu0 %320 }
  0xa9   : > { %v1636_v34 = vpop.eup %1635  ;;  %v604_v35 = vmul.f32 1.442695, %v566_v29  ;;  %v606_v36 = vmul.f32 1.442695, %v567_v30  ;;  %v434_v20 = vsel %vm425_vm1, %v417_v38, %v329_v31  ;;  %v430_v41 = vsel %vm425_vm1, %v413_v39, %v321_v32 }
  0xaa   : > { %v1638_v37 = vpop.eup %1637 }
  0xab   : > { %1643 = vpow2.f32 %v604_v35  ;;  %725 = vmatprep.mubr.f32.mxu0 %v1638_v37 }
  0xac   : > { %1645 = vpow2.f32 %v606_v36  ;;  %726 = vmatmul.mubr.f32.gmra.mrb[2].mxu0 %v1636_v34  ;;  %v377_v42 = vpop.permute.xlu1 %376  ;;  %v369_v43 = vpop.permute.xlu0 %368 }
  0xad   : > { %v451_v44 = vsel %vm442_vm2, %v434_v20, %v377_v42  ;;  %v447_v45 = vsel %vm442_vm2, %v430_v41, %v369_v43 }
  0xae   : > { %v494_v46 = vsub.f32 %v451_v44, %v2172_v11  ;;  %v495_v51 = vsub.f32 %v451_v44, %v2175_v12  ;;  %v486_v47 = vsub.f32 %v447_v45, %v2172_v11  ;;  %v487_v52 = vsub.f32 %v447_v45, %v2175_v12 }
  0xb0   : > { %v1640_v48 = vpop.eup %1639  ;;  %v526_v49 = vmul.f32 %v494_v46, %v494_v46  ;;  %v527_v50 = vmul.f32 %v495_v51, %v495_v51  ;;  %v518_v53 = vmul.f32 %v486_v47, %v486_v47  ;;  %v519_v0 = vmul.f32 %v487_v52, %v487_v52  ;;  %v283_v4 = vpop.permute.xlu1 %282 }
  0xb1   : > { %v275_v33 = vpop.permute.xlu0 %274  ;;  %v1642_v5 = vpop.eup %1641  ;;  %v418_v40 = vsel %vm408_vm0, %v2066_v54, %v283_v4 }
  0xb2   : > { %v576_v6 = vmul.f32 %v2185_v22, %v526_v49  ;;  %v568_v9 = vmul.f32 %v2185_v22, %v518_v53  ;;  %v569_v10 = vmul.f32 %v2190_v25, %v519_v0  ;;  %730 = vmatprep.mubr.f32.mxu0 %v1642_v5  ;;  %v577_v13 = vmul.f32 %v2190_v25, %v527_v50 }
  0xb3   : > { %731 = vmatmul.mubr.f32.gmra.mrb[4].mxu0 %v1640_v48  ;;  %v414_v26 = vsel %vm408_vm0, %v2069_v55, %v275_v33 }
  0xb4   : > { %v624_v14 = vmul.f32 1.442695, %v576_v6  ;;  %v608_v15 = vmul.f32 1.442695, %v568_v9  ;;  %v610_v16 = vmul.f32 1.442695, %v569_v10  ;;  %v331_v18 = vpop.permute.xlu1 %330 }
  0xb5   : > { %v323_v19 = vpop.permute.xlu0 %322  ;;  %v1644_v21 = vpop.eup %1643  ;;  %v626_v23 = vmul.f32 1.442695, %v577_v13  ;;  %v435_v17 = vsel %vm425_vm1, %v418_v40, %v331_v18 }
  0xb6   : > { %v1646_v24 = vpop.eup %1645  ;;  %1647 = vpow2.f32 %v624_v14  ;;  %v431_v27 = vsel %vm425_vm1, %v414_v26, %v323_v19 }
  0xb7   : > { %1649 = vpow2.f32 %v608_v15  ;;  %735 = vmatprep.mubr.f32.mxu0 %v1646_v24 }
  0xb8   : > { %1651 = vpow2.f32 %v610_v16  ;;  %736 = vmatmul.mubr.f32.gmra.mrb[6].mxu0 %v1644_v21  ;;  %v379_v28 = vpop.permute.xlu1 %378 }
  0xb9   : > { %v371_v29 = vpop.permute.xlu0 %370  ;;  %v452_v30 = vsel %vm442_vm2, %v435_v17, %v379_v28  ;;  %1653 = vpow2.f32 %v626_v23 }
  0xba   : > { %v448_v31 = vsel %vm442_vm2, %v431_v27, %v371_v29  ;;  %v496_v32 = vsub.f32 %v452_v30, %v2172_v11  ;;  %v497_v54 = vsub.f32 %v452_v30, %v2175_v12 }
  0xbb   : > { %v488_v55 = vsub.f32 %v448_v31, %v2172_v11  ;;  %v489_v34 = vsub.f32 %v448_v31, %v2175_v12 }
  0xbc   : > { %v528_v35 = vmul.f32 %v496_v32, %v496_v32  ;;  %v529_v36 = vmul.f32 %v497_v54, %v497_v54  ;;  %v285_v39 = vpop.permute.xlu1 %284 }
  0xbd   : > { %v520_v37 = vmul.f32 %v488_v55, %v488_v55  ;;  %v521_v38 = vmul.f32 %v489_v34, %v489_v34  ;;  %v277_v20 = vpop.permute.xlu0 %276  ;;  %v419_v4 = vsel %vm408_vm0, %v2084_v56, %v285_v39 }
  0xbe   : > { %v578_v41 = vmul.f32 %v2185_v22, %v528_v35  ;;  %v579_v42 = vmul.f32 %v2190_v25, %v529_v36  ;;  %v415_v33 = vsel %vm408_vm0, %v2087_v57, %v277_v20 }
  0xbf   : > { %v570_v43 = vmul.f32 %v2185_v22, %v520_v37  ;;  %v571_v44 = vmul.f32 %v2190_v25, %v521_v38 }
  0xc0   : > { %v1648_v45 = vpop.eup %1647  ;;  %v628_v46 = vmul.f32 1.442695, %v578_v41  ;;  %v630_v51 = vmul.f32 1.442695, %v579_v42  ;;  %v333_v52 = vpop.permute.xlu1 %332 }
  0xc1   : > { %v612_v47 = vmul.f32 1.442695, %v570_v43  ;;  %v325_v48 = vpop.permute.xlu0 %324  ;;  %v1650_v49 = vpop.eup %1649  ;;  %v614_v50 = vmul.f32 1.442695, %v571_v44  ;;  %v436_v5 = vsel %vm425_vm1, %v419_v4, %v333_v52 }
  0xc2   : > { %v1652_v53 = vpop.eup %1651  ;;  %1655 = vpow2.f32 %v628_v46  ;;  %v432_v6 = vsel %vm425_vm1, %v415_v33, %v325_v48 }
  0xc3   : > { %v1654_v0 = vpop.eup %1653  ;;  %1657 = vpow2.f32 %v630_v51  ;;  %740 = vmatprep.mubr.f32.mxu0 %v1652_v53 }
  0xc4   : > { %1659 = vpow2.f32 %v612_v47  ;;  %760 = vmatprep.mubr.f32.mxu1 %v1654_v0  ;;  %741 = vmatmul.mubr.f32.gmra.mrb[8].mxu0 %v1650_v49  ;;  %v381_v9 = vpop.permute.xlu1 %380 }
  0xc5   : > { %v373_v10 = vpop.permute.xlu0 %372  ;;  %1661 = vpow2.f32 %v614_v50  ;;  %761 = vmatmul.mubr.f32.vlgmr.msra.gmra.mrb[0].mxu1 %v1648_v45  ;;  %v453_v13 = vsel %vm442_vm2, %v436_v5, %v381_v9 }
  0xc6   : > { %v449_v14 = vsel %vm442_vm2, %v432_v6, %v373_v10  ;;  %v498_v56 = vsub.f32 %v453_v13, %v2172_v11  ;;  %v499_v57 = vsub.f32 %v453_v13, %v2175_v12 }
  0xc7   : > { %v490_v15 = vsub.f32 %v449_v14, %v2172_v11  ;;  %v491_v16 = vsub.f32 %v449_v14, %v2175_v12 }
  0xc8   : > { %v530_v18 = vmul.f32 %v498_v56, %v498_v56  ;;  %v531_v19 = vmul.f32 %v499_v57, %v499_v57  ;;  %v287_v24 = vpop.permute.xlu1 %286 }
  0xc9   : > { %v522_v21 = vmul.f32 %v490_v15, %v490_v15  ;;  %v523_v23 = vmul.f32 %v491_v16, %v491_v16  ;;  %v279_v40 = vpop.permute.xlu0 %278  ;;  %v420_v38 = vsel %vm408_vm0, %v2102_v58, %v287_v24 }
  0xca   : > { %v580_v26 = vmul.f32 %v2185_v22, %v530_v18  ;;  %v581_v17 = vmul.f32 %v2190_v25, %v531_v19  ;;  %v416_v39 = vsel %vm408_vm0, %v2105_v59, %v279_v40 }
  0xcb   : > { %v572_v27 = vmul.f32 %v2185_v22, %v522_v21  ;;  %v573_v28 = vmul.f32 %v2190_v25, %v523_v23 }
  0xcc   : > { %v1656_v29 = vpop.eup %1655  ;;  %v632_v30 = vmul.f32 1.442695, %v580_v26  ;;  %v634_v31 = vmul.f32 1.442695, %v581_v17  ;;  %v335_v54 = vpop.permute.xlu1 %334 }
  0xcd   : > { %v616_v32 = vmul.f32 1.442695, %v572_v27  ;;  %v327_v55 = vpop.permute.xlu0 %326  ;;  %v1658_v34 = vpop.eup %1657  ;;  %v618_v35 = vmul.f32 1.442695, %v573_v28  ;;  %v437_v20 = vsel %vm425_vm1, %v420_v38, %v335_v54 }
  0xce   : > { %v1660_v36 = vpop.eup %1659  ;;  %1663 = vpow2.f32 %v632_v30  ;;  %765 = vmatprep.mubr.f32.mxu1 %v1658_v34  ;;  %v433_v41 = vsel %vm425_vm1, %v416_v39, %v327_v55 }
  0xcf   : > { %v1662_v37 = vpop.eup %1661  ;;  %1665 = vpow2.f32 %v634_v31  ;;  %766 = vmatmul.mubr.f32.gmra.mrb[2].mxu1 %v1656_v29 }
  0xd0   : > { %1667 = vpow2.f32 %v616_v32  ;;  %745 = vmatprep.mubr.f32.mxu0 %v1662_v37  ;;  %v383_v42 = vpop.permute.xlu1 %382 }
  0xd1   : > { %v375_v43 = vpop.permute.xlu0 %374  ;;  %1669 = vpow2.f32 %v618_v35  ;;  %746 = vmatmul.mubr.f32.gmra.mrb[10].mxu0 %v1660_v36  ;;  %v454_v44 = vsel %vm442_vm2, %v437_v20, %v383_v42 }
  0xd2   : > { %v450_v45 = vsel %vm442_vm2, %v433_v41, %v375_v43  ;;  %v500_v58 = vsub.f32 %v454_v44, %v2172_v11  ;;  %v501_v46 = vsub.f32 %v454_v44, %v2175_v12 }
  0xd3   : > { %v492_v59 = vsub.f32 %v450_v45, %v2172_v11  ;;  %v493_v51 = vsub.f32 %v450_v45, %v2175_v12 }
  0xd4   : > { %v532_v47 = vmul.f32 %v500_v58, %v500_v58  ;;  %v533_v52 = vmul.f32 %v501_v46, %v501_v46  ;;  %v337_v53 = vpop.permute.xlu1 %336 }
  0xd5   : > { %v524_v48 = vmul.f32 %v492_v59, %v492_v59  ;;  %v525_v49 = vmul.f32 %v493_v51, %v493_v51  ;;  %v289_v50 = vpop.permute.xlu0 %288 }
  0xd6   : > { %v421_v0 = vsel %vm408_vm0, %v2120_v60, %v289_v50  ;;  %v582_v4 = vmul.f32 %v2185_v22, %v532_v47  ;;  %v583_v33 = vmul.f32 %v2190_v25, %v533_v52 }
  0xd7   : > { %v574_v5 = vmul.f32 %v2185_v22, %v524_v48  ;;  %v575_v6 = vmul.f32 %v2190_v25, %v525_v49  ;;  %v438_v56 = vsel %vm425_vm1, %v421_v0, %v337_v53 }
  0xd8   : > { %v1664_v9 = vpop.eup %1663  ;;  %v636_v10 = vmul.f32 1.442695, %v582_v4  ;;  %v638_v13 = vmul.f32 1.442695, %v583_v33  ;;  %v291_v15 = vpop.permute.xlu1 %290 }
  0xd9   : > { %v620_v14 = vmul.f32 1.442695, %v574_v5  ;;  %v385_v57 = vpop.permute.xlu0 %384  ;;  %v1666_v16 = vpop.eup %1665  ;;  %v622_v18 = vmul.f32 1.442695, %v575_v6  ;;  %v422_v17 = vsel %vm408_vm0, %v2127_v61, %v291_v15 }
  0xda   : > { %v455_v60 = vsel %vm442_vm2, %v438_v56, %v385_v57  ;;  %v1668_v19 = vpop.eup %1667  ;;  %1671 = vpow2.f32 %v636_v10  ;;  %770 = vmatprep.mubr.f32.mxu1 %v1666_v16 }
  0xdb   : > { %v502_v21 = vsub.f32 %v455_v60, %v2172_v11  ;;  %v503_v23 = vsub.f32 %v455_v60, %v2175_v12  ;;  %v1670_v24 = vpop.eup %1669  ;;  %1673 = vpow2.f32 %v638_v13  ;;  %771 = vmatmul.mubr.f32.gmra.mrb[4].mxu1 %v1664_v9 }
  0xdc   : > { %1675 = vpow2.f32 %v620_v14  ;;  %750 = vmatprep.mubr.f32.mxu0 %v1670_v24  ;;  %v387_v28 = vpop.permute.xlu1 %386 }
  0xdd   : > { %v534_v40 = vmul.f32 %v502_v21, %v502_v21  ;;  %v535_v26 = vmul.f32 %v503_v23, %v503_v23  ;;  %v339_v27 = vpop.permute.xlu0 %338  ;;  %1677 = vpow2.f32 %v622_v18  ;;  %751 = vmatmul.mubr.f32.gmra.mrb[12].mxu0 %v1668_v19 }
  0xde   : > { %v439_v29 = vsel %vm425_vm1, %v422_v17, %v339_v27 }
  0xdf   : > { %v584_v30 = vmul.f32 %v2185_v22, %v534_v40  ;;  %v585_v31 = vmul.f32 %v2190_v25, %v535_v26  ;;  %v456_v32 = vsel %vm442_vm2, %v439_v29, %v387_v28 }
  0xe0   : > { %v504_v54 = vsub.f32 %v456_v32, %v2172_v11  ;;  %v505_v55 = vsub.f32 %v456_v32, %v2175_v12  ;;  %v341_v36 = vpop.permute.xlu1 %340 }
  0xe1   : > { %v640_v34 = vmul.f32 1.442695, %v584_v30  ;;  %v642_v35 = vmul.f32 1.442695, %v585_v31  ;;  %v293_v61 = vpop.permute.xlu0 %292 }
  0xe2   : > { %v536_v37 = vmul.f32 %v504_v54, %v504_v54  ;;  %v537_v38 = vmul.f32 %v505_v55, %v505_v55  ;;  %v423_v39 = vsel %vm408_vm0, %v2138_v62, %v293_v61 }
  0xe3   : > { %1679 = vpow2.f32 %v640_v34  ;;  %v440_v43 = vsel %vm425_vm1, %v423_v39, %v341_v36 }
  0xe4   : > { %1681 = vpow2.f32 %v642_v35  ;;  %v586_v20 = vmul.f32 %v2185_v22, %v536_v37  ;;  %v587_v41 = vmul.f32 %v2190_v25, %v537_v38  ;;  %v1672_v42 = vpop.eup %1671  ;;  %v295_v45 = vpop.permute.xlu1 %294 }
  0xe5   : > { %v389_v44 = vpop.permute.xlu0 %388  ;;  %v1674_v58 = vpop.eup %1673  ;;  %v424_v53 = vsel %vm408_vm0, %v2145_v63, %v295_v45 }
  0xe6   : > { %v644_v46 = vmul.f32 1.442695, %v586_v20  ;;  %v646_v59 = vmul.f32 1.442695, %v587_v41  ;;  %v457_v51 = vsel %vm442_vm2, %v440_v43, %v389_v44  ;;  %v1676_v47 = vpop.eup %1675  ;;  %775 = vmatprep.mubr.f32.mxu1 %v1674_v58 }
  0xe7   : > { %v506_v52 = vsub.f32 %v457_v51, %v2172_v11  ;;  %v507_v62 = vsub.f32 %v457_v51, %v2175_v12  ;;  %v1678_v48 = vpop.eup %1677  ;;  %776 = vmatmul.mubr.f32.gmra.mrb[6].mxu1 %v1672_v42  ;;  %v2317_v42 = vld [vmem:[%s2805_s3] sm:$0xff] }
  0xe8   : > { %1683 = vpow2.f32 %v644_v46  ;;  %755 = vmatprep.mubr.f32.mxu0 %v1678_v48  ;;  %v391_v4 = vpop.permute.xlu1 %390  ;;  %v2321_v44 = vrot.slane %v2317_v42, %v2158_v2 }
  0xe9   : > { %1685 = vpow2.f32 %v646_v59  ;;  %v538_v49 = vmul.f32 %v506_v52, %v506_v52  ;;  %v539_v50 = vmul.f32 %v507_v62, %v507_v62  ;;  %v343_v0 = vpop.permute.xlu0 %342  ;;  %756 = vmatmul.mubr.f32.gmra.mrb[14].mxu0 %v1676_v47 }
  0xea   : > { %v441_v33 = vsel %vm425_vm1, %v424_v53, %v343_v0  ;;  %v2328_v53 = vrot.slane %v2317_v42, %v2168_v7 }
  0xeb   : > { %v588_v5 = vmul.f32 %v2185_v22, %v538_v49  ;;  %v589_v6 = vmul.f32 %v2190_v25, %v539_v50  ;;  %v458_v9 = vsel %vm442_vm2, %v441_v33, %v391_v4 }
  0xec   : > { %v508_v10 = vsub.f32 %v458_v9, %v2172_v11  ;;  %v509_v13 = vsub.f32 %v458_v9, %v2175_v12 }
  0xed   : > { %v1680_v14 = vpop.eup %1679  ;;  %v648_v56 = vmul.f32 1.442695, %v588_v5  ;;  %v650_v57 = vmul.f32 1.442695, %v589_v6 }
  0xee   : > { %v1682_v63 = vpop.eup %1681  ;;  %v540_v15 = vmul.f32 %v508_v10, %v508_v10  ;;  %v541_v16 = vmul.f32 %v509_v13, %v509_v13 }
  0xef   : > { %1687 = vpow2.f32 %v648_v56  ;;  %780 = vmatprep.mubr.f32.mxu1 %v1682_v63 }
  0xf0   : > { %1689 = vpow2.f32 %v650_v57  ;;  %v590_v18 = vmul.f32 %v2185_v22, %v540_v15  ;;  %v591_v60 = vmul.f32 %v2190_v25, %v541_v16  ;;  %781 = vmatmul.mubr.f32.gmra.mrb[8].mxu1 %v1680_v14 }
  0xf2   : > { %v1684_v19 = vpop.eup %1683  ;;  %v652_v21 = vmul.f32 1.442695, %v590_v18  ;;  %v654_v23 = vmul.f32 1.442695, %v591_v60 }
  0xf3   : > { %v1686_v11 = vpop.eup %1685 }
  0xf4   : > { %1691 = vpow2.f32 %v652_v21  ;;  %785 = vmatprep.mubr.f32.mxu1 %v1686_v11 }
  0xf5   : > { %1693 = vpow2.f32 %v654_v23  ;;  %786 = vmatmul.mubr.f32.gmra.mrb[10].mxu1 %v1684_v19 }
  0xf9   : > { %v1688_v12 = vpop.eup %1687 }
  0xfa   : > { %v1690_v24 = vpop.eup %1689 }
  0xfb   : > { %790 = vmatprep.mubr.f32.mxu1 %v1690_v24 }
  0xfc   : > { %791 = vmatmul.mubr.f32.gmra.mrb[12].mxu1 %v1688_v12 }
  0xfe   : > { %v1692_v40 = vpop.eup %1691 }
  0xff   : > { %v1694_v26 = vpop.eup %1693 }
 0x100   : > { %795 = vmatprep.mubr.f32.mxu1 %v1694_v26 }
 0x101   : > { %796 = vmatmul.mubr.f32.gmra.mrb[14].mxu1 %v1692_v40 }
 0x17b   : > { %v1491_v22 = vpop.f32.mrb[0].mxu0 }
 0x17c   : > { %v1492_v17 = vpop.f32.mrb[1].mxu0 }
 0x17d   : > { %v1493_v25 = vadd.f32 %v1492_v17, %v1491_v22 }
 0x17f   : > { %v1439_v27 = vmul.f32 -1.442695, %v1493_v25  ;;  %v1494_v28 = vpop.f32.mrb[2].mxu0 }
 0x180   : > { %v1495_v29 = vpop.f32.mrb[3].mxu0 }
 0x181   : > { %1695 = vpow2.f32 %v1439_v27  ;;  %v1496_v30 = vadd.f32 %v1495_v29, %v1494_v28 }
 0x183   : > { %v1440_v31 = vmul.f32 -1.442695, %v1496_v30 }
 0x185   : > { %1697 = vpow2.f32 %v1440_v31 }
 0x186   : > { %v1497_v32 = vpop.f32.mrb[4].mxu0 }
 0x187   : > { %v1498_v54 = vpop.f32.mrb[5].mxu0 }
 0x188   : > { %v1499_v55 = vadd.f32 %v1498_v54, %v1497_v32 }
 0x18a   : > { %v1441_v34 = vmul.f32 -1.442695, %v1499_v55 }
 0x18b   : > { %v1696_v35 = vpop.eup %1695  ;;  %v1500_v61 = vpop.f32.mrb[6].mxu0 }
 0x18c   : > { %v849_v36 = vadd.f32 1.0, %v1696_v35  ;;  %1699 = vpow2.f32 %v1441_v34  ;;  %v1501_v37 = vpop.f32.mrb[7].mxu0 }
 0x18d   : > { %v1502_v38 = vadd.f32 %v1501_v37, %v1500_v61 }
 0x18e   : > { %1701 = vrcp.f32 %v849_v36 }
 0x18f   : > { %v1698_v39 = vpop.eup %1697  ;;  %v1442_v20 = vmul.f32 -1.442695, %v1502_v38 }
 0x190   : > { %v850_v41 = vadd.f32 1.0, %v1698_v39 }
 0x191   : > { %1703 = vpow2.f32 %v1442_v20 }
 0x192   : > { %1705 = vrcp.f32 %v850_v41 }
 0x196   : > { %v1700_v43 = vpop.eup %1699 }
 0x197   : > { %v851_v45 = vadd.f32 1.0, %v1700_v43  ;;  %v1503_v58 = vpop.f32.mrb[8].mxu0 }
 0x198   : > { %v1702_v46 = vpop.eup %1701  ;;  %v1515_v59 = vpop.f32.mrb[0].mxu1 }
 0x199   : > { %v1504_v51 = vpop.f32.mrb[9].mxu0  ;;  %v897_v47 = vmul.f32 %v1702_v46, %v1493_v25  ;;  %1707 = vrcp.f32 %v851_v45  ;;  %v1516_v62 = vpop.f32.mrb[1].mxu1 }
 0x19a   : > { %v1505_v52 = vadd.f32 %v1504_v51, %v1503_v58  ;;  %v2323_v48 = vadd.f32 %v1516_v62, %v1515_v59 }
 0x19b   : > { %v1704_v49 = vpop.eup %1703  ;;  %v917_v50 = vmul.f32 %v2321_v44, %v897_v47 }
 0x19c   : > { %v1443_v2 = vmul.f32 -1.442695, %v1505_v52  ;;  %v1706_v0 = vpop.eup %1705  ;;  %v852_v4 = vadd.f32 1.0, %v1704_v49  ;;  %v1447_v34 = vmul.f32 -1.442695, %v2323_v48 }
 0x19d   : > { %v898_v33 = vmul.f32 %v1706_v0, %v1496_v30  ;;  %v2331_v5 = vadd.f32 %v2328_v53, %v917_v50 }
 0x19e   : > { %1709 = vpow2.f32 %v1443_v2 }
 0x19f   : > { %1711 = vrcp.f32 %v852_v4  ;;  %v918_v6 = vmul.f32 %v2321_v44, %v898_v33  ;;  %v954_v7 = vsel %vm953_vm3, %v2331_v5, 0.0 }
 0x1a1   : > { %v2335_v9 = vadd.f32 %v2328_v53, %v918_v6 }
 0x1a2   : > { %v1518_v10 = vpop.f32.mrb[2].mxu1 }
 0x1a3   : > { %v1708_v13 = vpop.eup %1707  ;;  %v955_v14 = vsel %vm953_vm3, %v2335_v9, 0.0  ;;  %v1519_v56 = vpop.f32.mrb[3].mxu1 }
 0x1a4   : > { %v956_v57 = vadd.f32 %v955_v14, %v954_v7  ;;  %v899_v63 = vmul.f32 %v1708_v13, %v1499_v55  ;;  %v1506_v15 = vpop.f32.mrb[10].mxu0  ;;  %v2341_v16 = vadd.f32 %v1519_v56, %v1518_v10 }
 0x1a5   : > { %v1507_v18 = vpop.f32.mrb[11].mxu0 }
 0x1a6   : > { %v919_v60 = vmul.f32 %v2321_v44, %v899_v63  ;;  %v1508_v19 = vadd.f32 %v1507_v18, %v1506_v15  ;;  %v1448_v39 = vmul.f32 -1.442695, %v2341_v16 }
 0x1a8   : > { %v1710_v21 = vpop.eup %1709  ;;  %v2345_v11 = vadd.f32 %v2328_v53, %v919_v60  ;;  %v1444_v24 = vmul.f32 -1.442695, %v1508_v19 }
 0x1a9   : > { %v1712_v23 = vpop.eup %1711  ;;  %v853_v12 = vadd.f32 1.0, %v1710_v21 }
 0x1aa   : > { %v900_v40 = vmul.f32 %v1712_v23, %v1502_v38  ;;  %v957_v26 = vsel %vm953_vm3, %v2345_v11, 0.0 }
 0x1ab   : > { %1713 = vrcp.f32 %v853_v12  ;;  %v958_v22 = vadd.f32 %v957_v26, %v956_v57 }
 0x1ac   : > { %v920_v17 = vmul.f32 %v2321_v44, %v900_v40  ;;  %1715 = vpow2.f32 %v1444_v24 }
 0x1ae   : > { %v2351_v25 = vadd.f32 %v2328_v53, %v920_v17  ;;  %v1521_v27 = vpop.f32.mrb[4].mxu1 }
 0x1af   : > { %v1522_v29 = vpop.f32.mrb[5].mxu1 }
 0x1b0   : > { %v959_v28 = vsel %vm953_vm3, %v2351_v25, 0.0  ;;  %v1509_v31 = vpop.f32.mrb[12].mxu0  ;;  %v2355_v32 = vadd.f32 %v1522_v29, %v1521_v27 }
 0x1b1   : > { %v960_v30 = vadd.f32 %v959_v28, %v958_v22  ;;  %v1510_v54 = vpop.f32.mrb[13].mxu0 }
 0x1b2   : > { %v1511_v55 = vadd.f32 %v1510_v54, %v1509_v31  ;;  %v1449_v41 = vmul.f32 -1.442695, %v2355_v32 }
 0x1b4   : > { %v1445_v61 = vmul.f32 -1.442695, %v1511_v55 }
 0x1b5   : > { %v1714_v35 = vpop.eup %1713 }
 0x1b6   : > { %v1716_v36 = vpop.eup %1715  ;;  %v901_v37 = vmul.f32 %v1714_v35, %v1505_v52  ;;  %1717 = vpow2.f32 %v1445_v61 }
 0x1b7   : > { %v854_v38 = vadd.f32 1.0, %v1716_v36  ;;  %1719 = vpow2.f32 %v1447_v34 }
 0x1b8   : > { %v921_v20 = vmul.f32 %v2321_v44, %v901_v37 }
 0x1b9   : > { %1721 = vrcp.f32 %v854_v38 }
 0x1ba   : > { %v2362_v43 = vadd.f32 %v2328_v53, %v921_v20  ;;  %1723 = vpow2.f32 %v1448_v39  ;;  %v1524_v45 = vpop.f32.mrb[6].mxu1 }
 0x1bb   : > { %1725 = vpow2.f32 %v1449_v41  ;;  %v1525_v46 = vpop.f32.mrb[7].mxu1 }
 0x1bc   : > { %v961_v58 = vsel %vm953_vm3, %v2362_v43, 0.0  ;;  %v1512_v51 = vpop.f32.mrb[14].mxu0  ;;  %v2366_v47 = vadd.f32 %v1525_v46, %v1524_v45 }
 0x1bd   : > { %v962_v59 = vadd.f32 %v961_v58, %v960_v30  ;;  %v1513_v52 = vpop.f32.mrb[15].mxu0 }
 0x1be   : > { %v2368_v62 = vadd.f32 %v1513_v52, %v1512_v51  ;;  %v1450_v49 = vmul.f32 -1.442695, %v2366_v47 }
 0x1c0   : > { %v1718_v50 = vpop.eup %1717  ;;  %v1446_v2 = vmul.f32 -1.442695, %v2368_v62  ;;  %1727 = vpow2.f32 %v1450_v49 }
 0x1c1   : > { %v1720_v0 = vpop.eup %1719  ;;  %v855_v4 = vadd.f32 1.0, %v1718_v50 }
 0x1c2   : > { %1729 = vpow2.f32 %v1446_v2  ;;  %v857_v57 = vadd.f32 1.0, %v1720_v0 }
 0x1c3   : > { %v1722_v33 = vpop.eup %1721  ;;  %v1527_v6 = vpop.f32.mrb[8].mxu1  ;;  %1731 = vrcp.f32 %v855_v4 }
 0x1c4   : > { %v902_v10 = vmul.f32 %v1722_v33, %v1508_v19  ;;  %v1528_v13 = vpop.f32.mrb[9].mxu1  ;;  %v1724_v7 = vpop.eup %1723 }
 0x1c5   : > { %v2372_v14 = vadd.f32 %v1528_v13, %v1527_v6  ;;  %v1726_v56 = vpop.eup %1725  ;;  %v858_v60 = vadd.f32 1.0, %v1724_v7 }
 0x1c6   : > { %v922_v63 = vmul.f32 %v2321_v44, %v902_v10  ;;  %v859_v23 = vadd.f32 1.0, %v1726_v56 }
 0x1c7   : > { %v1451_v15 = vmul.f32 -1.442695, %v2372_v14 }
 0x1c8   : > { %v2377_v18 = vadd.f32 %v2328_v53, %v922_v63  ;;  %v1530_v21 = vpop.f32.mrb[10].mxu1 }
 0x1c9   : > { %1733 = vpow2.f32 %v1451_v15  ;;  %v1531_v12 = vpop.f32.mrb[11].mxu1 }
 0x1ca   : > { %1735 = vrcp.f32 %v857_v57  ;;  %v963_v19 = vsel %vm953_vm3, %v2377_v18, 0.0  ;;  %v2381_v24 = vadd.f32 %v1531_v12, %v1530_v21  ;;  %v1728_v40 = vpop.eup %1727 }
 0x1cb   : > { %v964_v26 = vadd.f32 %v963_v19, %v962_v59  ;;  %1737 = vrcp.f32 %v858_v60  ;;  %v860_v22 = vadd.f32 1.0, %v1728_v40 }
 0x1cc   : > { %v1452_v17 = vmul.f32 -1.442695, %v2381_v24  ;;  %v1730_v27 = vpop.eup %1729  ;;  %1739 = vrcp.f32 %v859_v23 }
 0x1cd   : > { %v1732_v28 = vpop.eup %1731  ;;  %v856_v29 = vadd.f32 1.0, %v1730_v27  ;;  %1741 = vrcp.f32 %v860_v22 }
 0x1ce   : > { %v903_v30 = vmul.f32 %v1732_v28, %v1511_v55  ;;  %1743 = vpow2.f32 %v1452_v17 }
 0x1cf   : > { %v1533_v31 = vpop.f32.mrb[12].mxu1  ;;  %1745 = vrcp.f32 %v856_v29 }
 0x1d0   : > { %v1534_v54 = vpop.f32.mrb[13].mxu1  ;;  %v923_v34 = vmul.f32 %v2321_v44, %v903_v30 }
 0x1d1   : > { %v2385_v35 = vadd.f32 %v1534_v54, %v1533_v31 }
 0x1d2   : > { %v2388_v36 = vadd.f32 %v2328_v53, %v923_v34 }
 0x1d3   : > { %v1734_v61 = vpop.eup %1733  ;;  %v1453_v37 = vmul.f32 -1.442695, %v2385_v35 }
 0x1d4   : > { %v1736_v38 = vpop.eup %1735  ;;  %v861_v39 = vadd.f32 1.0, %v1734_v61  ;;  %v1536_v20 = vpop.f32.mrb[14].mxu1  ;;  %v965_v55 = vsel %vm953_vm3, %v2388_v36, 0.0 }
 0x1d5   : > { %1747 = vpow2.f32 %v1453_v37  ;;  %v1537_v41 = vpop.f32.mrb[15].mxu1  ;;  %v1738_v45 = vpop.eup %1737  ;;  %v966_v58 = vadd.f32 %v965_v55, %v964_v26  ;;  %v905_v51 = vmul.f32 %v1736_v38, %v2323_v48 }
 0x1d6   : > { %1749 = vrcp.f32 %v861_v39  ;;  %v1538_v46 = vadd.f32 %v1537_v41, %v1536_v20  ;;  %v1740_v59 = vpop.eup %1739  ;;  %v906_v2 = vmul.f32 %v1738_v45, %v2341_v16 }
 0x1d7   : > { %v1742_v52 = vpop.eup %1741  ;;  %v925_v33 = vmul.f32 %v2321_v44, %v905_v51  ;;  %v907_v6 = vmul.f32 %v1740_v59, %v2355_v32 }
 0x1d8   : > { %v1454_v49 = vmul.f32 -1.442695, %v1538_v46  ;;  %v1744_v50 = vpop.eup %1743  ;;  %v926_v13 = vmul.f32 %v2321_v44, %v906_v2  ;;  %v908_v48 = vmul.f32 %v1742_v52, %v2366_v47 }
 0x1d9   : > { %v1746_v0 = vpop.eup %1745  ;;  %v862_v4 = vadd.f32 1.0, %v1744_v50  ;;  %v945_v57 = vadd.f32 %v2328_v53, %v925_v33  ;;  %v927_v16 = vmul.f32 %v2321_v44, %v907_v6 }
 0x1da   : > { %1751 = vpow2.f32 %v1454_v49  ;;  %v904_v10 = vmul.f32 %v1746_v0, %v2368_v62  ;;  %v946_v32 = vadd.f32 %v2328_v53, %v926_v13  ;;  %v928_v21 = vmul.f32 %v2321_v44, %v908_v48 }
 0x1db   : > { %1753 = vrcp.f32 %v862_v4  ;;  %v969_v47 = vsel %vm953_vm3, %v945_v57, 0.0  ;;  %v947_v19 = vadd.f32 %v2328_v53, %v927_v16 }
 0x1dc   : > { %v924_v7 = vmul.f32 %v2321_v44, %v904_v10  ;;  %v971_v17 = vsel %vm953_vm3, %v946_v32, 0.0  ;;  %v948_v27 = vadd.f32 %v2328_v53, %v928_v21 }
 0x1dd   : > { %v973_v31 = vsel %vm953_vm3, %v947_v19, 0.0 }
 0x1de   : > { %v944_v63 = vadd.f32 %v2328_v53, %v924_v7  ;;  %v975_v61 = vsel %vm953_vm3, %v948_v27, 0.0 }
 0x1df   : > { %v1748_v56 = vpop.eup %1747 }
 0x1e0   : > { %v1750_v15 = vpop.eup %1749  ;;  %v863_v60 = vadd.f32 1.0, %v1748_v56  ;;  %v967_v62 = vsel %vm953_vm3, %v944_v63, 0.0 }
 0x1e1   : > { %v909_v23 = vmul.f32 %v1750_v15, %v2372_v14  ;;  %v968_v12 = vadd.f32 %v967_v62, %v966_v58 }
 0x1e2   : > { %1755 = vrcp.f32 %v863_v60 }
 0x1e3   : > { %v929_v40 = vmul.f32 %v2321_v44, %v909_v23  ;;  %v970_v22 = vadd.f32 %v969_v47, %v968_v12 }
 0x1e4   : > { %v1752_v26 = vpop.eup %1751 }
 0x1e5   : > { %v864_v28 = vadd.f32 1.0, %v1752_v26  ;;  %v1754_v29 = vpop.eup %1753  ;;  %v972_v30 = vadd.f32 %v971_v17, %v970_v22  ;;  %v949_v14 = vadd.f32 %v2328_v53, %v929_v40 }
 0x1e6   : > { %v910_v54 = vmul.f32 %v1754_v29, %v2381_v24 }
 0x1e7   : > { %1757 = vrcp.f32 %v864_v28  ;;  %v974_v34 = vadd.f32 %v973_v31, %v972_v30  ;;  %v977_v39 = vsel %vm953_vm3, %v949_v14, 0.0 }
 0x1e8   : > { %v930_v37 = vmul.f32 %v2321_v44, %v910_v54 }
 0x1e9   : > { %v976_v38 = vadd.f32 %v975_v61, %v974_v34 }
 0x1ea   : > { %v950_v20 = vadd.f32 %v2328_v53, %v930_v37 }
 0x1eb   : > { %v978_v41 = vadd.f32 %v977_v39, %v976_v38 }
 0x1ec   : > { %v1756_v55 = vpop.eup %1755  ;;  %v979_v45 = vsel %vm953_vm3, %v950_v20, 0.0 }
 0x1ed   : > { %v911_v58 = vmul.f32 %v1756_v55, %v2385_v35  ;;  %v980_v59 = vadd.f32 %v979_v45, %v978_v41 }
 0x1ef   : > { %v931_v24 = vmul.f32 %v2321_v44, %v911_v58 }
 0x1f1   : > { %v1758_v51 = vpop.eup %1757  ;;  %v951_v52 = vadd.f32 %v2328_v53, %v931_v24 }
 0x1f2   : > { %v912_v49 = vmul.f32 %v1758_v51, %v1538_v46 }
 0x1f3   : > { %v981_v50 = vsel %vm953_vm3, %v951_v52, 0.0 }
 0x1f4   : > { %v982_v2 = vadd.f32 %v981_v50, %v980_v59  ;;  %v932_v0 = vmul.f32 %v2321_v44, %v912_v49 }
 0x1f6   : > { %v952_v4 = vadd.f32 %v2328_v53, %v932_v0 }
 0x1f8   : > { %v983_v33 = vsel %vm953_vm3, %v952_v4, 0.0 }
 0x1f9   : > { %v984_v6 = vadd.f32 %v983_v33, %v982_v2 }
 0x1fb   : > { %v985_v10 = vrot.slane %v984_v6, 4 }
 0x1fd   : > { %v986_v13 = vadd.f32 %v985_v10, %v984_v6 }
 0x1ff   : > { %v987_v35 = vrot.slane %v986_v13, 2 }
 0x201   : > { %v988_v7 = vadd.f32 %v987_v35, %v986_v13 }
 0x203   : > { %v989_v48 = vrot.slane %v988_v7, 1 }
 0x205   : > { %v990_v56 = vadd.f32 %v989_v48, %v988_v7 }
 0x207   : > { %v992_v16 = vmul.f32 0.0078125, %v990_v56 }
 0x209   : > { %v2429_v15 = vsub.f32 %v2331_v5, %v992_v16  ;;  %v2432_v46 = vsub.f32 %v2335_v9, %v992_v16  ;;  %v2435_v44 = vsub.f32 %v2345_v11, %v992_v16  ;;  %v2438_v53 = vsub.f32 %v2351_v25, %v992_v16 }
 0x20a   : > { %v2441_v60 = vsub.f32 %v2362_v43, %v992_v16  ;;  %v2444_v62 = vsub.f32 %v2377_v18, %v992_v16  ;;  %v2447_v21 = vsub.f32 %v2388_v36, %v992_v16  ;;  %v2449_v5 = vsub.f32 %v944_v63, %v992_v16 }
 0x20b   : > { %v2451_v23 = vsub.f32 %v945_v57, %v992_v16  ;;  %v2453_v9 = vsub.f32 %v946_v32, %v992_v16  ;;  %v2455_v11 = vsub.f32 %v947_v19, %v992_v16  ;;  %v2457_v12 = vsub.f32 %v948_v27, %v992_v16 }
 0x20c   : > { %v2459_v25 = vsub.f32 %v949_v14, %v992_v16  ;;  %v2461_v43 = vsub.f32 %v950_v20, %v992_v16  ;;  %v2463_v47 = vsub.f32 %v951_v52, %v992_v16  ;;  %v2465_v18 = vsub.f32 %v952_v4, %v992_v16 }
 0x20d   : > { %v1009_v36 = vmul.f32 %v2429_v15, %v2429_v15  ;;  %v1010_v57 = vmul.f32 %v2432_v46, %v2432_v46  ;;  %v1011_v63 = vmul.f32 %v2435_v44, %v2435_v44  ;;  %v1012_v32 = vmul.f32 %v2438_v53, %v2438_v53 }
 0x20e   : > { %v1013_v22 = vmul.f32 %v2441_v60, %v2441_v60  ;;  %v1014_v28 = vmul.f32 %v2444_v62, %v2444_v62  ;;  %v1015_v31 = vmul.f32 %v2447_v21, %v2447_v21  ;;  %v1016_v34 = vmul.f32 %v2449_v5, %v2449_v5 }
 0x20f   : > { %v1025_v19 = vsel %vm953_vm3, %v1009_v36, 0.0  ;;  %v1026_v40 = vsel %vm953_vm3, %v1010_v57, 0.0  ;;  %v1028_v17 = vsel %vm953_vm3, %v1011_v63, 0.0  ;;  %v1030_v29 = vsel %vm953_vm3, %v1012_v32, 0.0 }
 0x210   : > { %v1027_v26 = vadd.f32 %v1026_v40, %v1025_v19  ;;  %v1032_v14 = vsel %vm953_vm3, %v1013_v22, 0.0  ;;  %v1034_v61 = vsel %vm953_vm3, %v1014_v28, 0.0  ;;  %v1017_v38 = vmul.f32 %v2451_v23, %v2451_v23 }
 0x211   : > { %v1036_v39 = vsel %vm953_vm3, %v1015_v31, 0.0  ;;  %v1018_v55 = vmul.f32 %v2453_v9, %v2453_v9  ;;  %v1038_v41 = vsel %vm953_vm3, %v1016_v34, 0.0  ;;  %v1019_v58 = vmul.f32 %v2455_v11, %v2455_v11 }
 0x212   : > { %v1029_v27 = vadd.f32 %v1028_v17, %v1027_v26  ;;  %v1040_v59 = vsel %vm953_vm3, %v1017_v38, 0.0  ;;  %v1020_v51 = vmul.f32 %v2457_v12, %v2457_v12  ;;  %v1021_v50 = vmul.f32 %v2459_v25, %v2459_v25 }
 0x213   : > { %v1042_v52 = vsel %vm953_vm3, %v1018_v55, 0.0  ;;  %v1044_v2 = vsel %vm953_vm3, %v1019_v58, 0.0  ;;  %v1022_v4 = vmul.f32 %v2461_v43, %v2461_v43  ;;  %v1023_v10 = vmul.f32 %v2463_v47, %v2463_v47 }
 0x214   : > { %v1031_v30 = vadd.f32 %v1030_v29, %v1029_v27  ;;  %v1046_v33 = vsel %vm953_vm3, %v1020_v51, 0.0  ;;  %v1048_v13 = vsel %vm953_vm3, %v1021_v50, 0.0  ;;  %v1024_v7 = vmul.f32 %v2465_v18, %v2465_v18 }
 0x215   : > { %v1050_v48 = vsel %vm953_vm3, %v1022_v4, 0.0  ;;  %v1052_v16 = vsel %vm953_vm3, %v1023_v10, 0.0  ;;  %v1084_v29 = vrot.slane %v2317_v42, %v466_v3  ;;  %v1104_v31 = vrot.slane %v2317_v42, %v548_v8 }
 0x216   : > { %v1033_v54 = vadd.f32 %v1032_v14, %v1031_v30  ;;  %v1054_v57 = vsel %vm953_vm3, %v1024_v7, 0.0 }
 0x218   : > { %v1035_v37 = vadd.f32 %v1034_v61, %v1033_v54 }
 0x21a   : > { %v1037_v20 = vadd.f32 %v1036_v39, %v1035_v37 }
 0x21c   : > { %v1039_v45 = vadd.f32 %v1038_v41, %v1037_v20 }
 0x21e   : > { %v1041_v24 = vadd.f32 %v1040_v59, %v1039_v45 }
 0x220   : > { %v1043_v49 = vadd.f32 %v1042_v52, %v1041_v24 }
 0x222   : > { %v1045_v0 = vadd.f32 %v1044_v2, %v1043_v49 }
 0x224   : > { %v1047_v6 = vadd.f32 %v1046_v33, %v1045_v0 }
 0x226   : > { %v1049_v35 = vadd.f32 %v1048_v13, %v1047_v6 }
 0x228   : > { %v1051_v56 = vadd.f32 %v1050_v48, %v1049_v35 }
 0x22a   : > { %v1053_v36 = vadd.f32 %v1052_v16, %v1051_v56 }
 0x22c   : > { %v1055_v63 = vadd.f32 %v1054_v57, %v1053_v36 }
 0x22e   : > { %v1056_v32 = vrot.slane %v1055_v63, 4 }
 0x230   : > { %v1057_v19 = vadd.f32 %v1056_v32, %v1055_v63 }
 0x232   : > { %v1058_v40 = vrot.slane %v1057_v19, 2 }
 0x234   : > { %v1059_v26 = vadd.f32 %v1058_v40, %v1057_v19 }
 0x236   : > { %v1060_v22 = vrot.slane %v1059_v26, 1 }
 0x238   : > { %v1061_v17 = vadd.f32 %v1060_v22, %v1059_v26  ;;  %v1834_v22 = vmov 0  }
 0x239   : > { %1630 = vset.pattern.permute.xlu0 %v1834_v22 }
 0x23a   : > { %v1062_v27 = vmul.f32 0.0078125, %v1061_v17  ;;  %1347 = vperm.xlu0 %1630, %v2317_v42  }
 0x23c   : > { %v1063_v28 = vadd.f32 1e-05, %v1062_v27 }
 0x23e   : > { %1759 = vrsqrt.f32 %v1063_v28  ;;  %v231_v28 = vld [vmem:[%s2805_s3 + $0x8] sm:$0x1] }
 0x23f   : > { %1359 = vperm.xlu0 %1630, %v231_v28  }
 0x248   : > { %v1760_v30 = vpop.eup %1759 }
 0x249   : > { %v1073_v14 = vmul.f32 %v1760_v30, %v2451_v23  ;;  %v1074_v54 = vmul.f32 %v1760_v30, %v2453_v9  ;;  %v1075_v34 = vmul.f32 %v1760_v30, %v2455_v11  ;;  %v1076_v61 = vmul.f32 %v1760_v30, %v2457_v12 }
 0x24a   : > { %v1077_v37 = vmul.f32 %v1760_v30, %v2459_v25  ;;  %v1078_v38 = vmul.f32 %v1760_v30, %v2461_v43  ;;  %v1079_v39 = vmul.f32 %v1760_v30, %v2463_v47  ;;  %v1080_v3 = vmul.f32 %v1760_v30, %v2465_v18 }
 0x24b   : > { %v1094_v20 = vmul.f32 %v1084_v29, %v1074_v54  ;;  %v1095_v55 = vmul.f32 %v1084_v29, %v1075_v34  ;;  %v1096_v41 = vmul.f32 %v1084_v29, %v1076_v61  ;;  %v1065_v8 = vmul.f32 %v1760_v30, %v2429_v15 }
 0x24c   : > { %v1097_v23 = vmul.f32 %v1084_v29, %v1077_v37  ;;  %v1098_v45 = vmul.f32 %v1084_v29, %v1078_v38  ;;  %v1099_v9 = vmul.f32 %v1084_v29, %v1079_v39  ;;  %v1100_v58 = vmul.f32 %v1084_v29, %v1080_v3 }
 0x24d   : > { %v2530_v11 = vadd.f32 %v1104_v31, %v1095_v55  ;;  %v2532_v12 = vadd.f32 %v1104_v31, %v1096_v41  ;;  %v1066_v25 = vmul.f32 %v1760_v30, %v2432_v46  ;;  %v1067_v43 = vmul.f32 %v1760_v30, %v2435_v44 }
 0x24e   : > { %v2536_v47 = vadd.f32 %v1104_v31, %v1097_v23  ;;  %v2538_v18 = vadd.f32 %v1104_v31, %v1098_v45  ;;  %v2540_v59 = vadd.f32 %v1104_v31, %v1099_v9  ;;  %v2542_v24 = vadd.f32 %v1104_v31, %v1100_v58 }
 0x24f   : > { %v1068_v15 = vmul.f32 %v1760_v30, %v2438_v53  ;;  %v1069_v51 = vmul.f32 %v1760_v30, %v2441_v60  ;;  %v1070_v52 = vmul.f32 %v1760_v30, %v2444_v62  ;;  %v1071_v49 = vmul.f32 %v1760_v30, %v2447_v21 }
 0x250   : > { %v1072_v46 = vmul.f32 %v1760_v30, %v2449_v5  ;;  %v1085_v50 = vmul.f32 %v1084_v29, %v1065_v8  ;;  %v1086_v44 = vmul.f32 %v1084_v29, %v1066_v25  ;;  %v1087_v2 = vmul.f32 %v1084_v29, %v1067_v43 }
 0x251   : > { %v1088_v0 = vmul.f32 %v1084_v29, %v1068_v15  ;;  %v1089_v4 = vmul.f32 %v1084_v29, %v1069_v51  ;;  %v1090_v33 = vmul.f32 %v1084_v29, %v1070_v52  ;;  %v1091_v6 = vmul.f32 %v1084_v29, %v1071_v49 }
 0x252   : > { %v1092_v10 = vmul.f32 %v1084_v29, %v1072_v46  ;;  %v1093_v13 = vmul.f32 %v1084_v29, %v1073_v14  ;;  %v1105_v35 = vadd.f32 %v1104_v31, %v1085_v50  ;;  %v1106_v7 = vadd.f32 %v1104_v31, %v1086_v44 }
 0x253   : > { %v1107_v53 = vadd.f32 %v1104_v31, %v1087_v2  ;;  %v1108_v48 = vadd.f32 %v1104_v31, %v1088_v0  ;;  %v1109_v60 = vadd.f32 %v1104_v31, %v1089_v4  ;;  %v1110_v56 = vadd.f32 %v1104_v31, %v1090_v33 }
 0x254   : > { %v1111_v62 = vadd.f32 %v1104_v31, %v1091_v6  ;;  %v1112_v16 = vadd.f32 %v1104_v31, %v1092_v10  ;;  %v1113_v21 = vadd.f32 %v1104_v31, %v1093_v13  ;;  %v1114_v36 = vadd.f32 %v1104_v31, %v1094_v20 }
 0x255   : > { %v1121_v5 = vsel %vm953_vm3, %v1105_v35, 0.0  ;;  %v1122_v57 = vsel %vm953_vm3, %v1106_v7, 0.0  ;;  %v1124_v32 = vsel %vm953_vm3, %v1107_v53, 0.0  ;;  %v1126_v40 = vsel %vm953_vm3, %v1108_v48, 0.0 }
 0x256   : > { %v1123_v63 = vadd.f32 %v1122_v57, %v1121_v5  ;;  %v1128_v17 = vsel %vm953_vm3, %v1109_v60, 0.0  ;;  %v1130_v29 = vsel %vm953_vm3, %v1110_v56, 0.0  ;;  %v1132_v31 = vsel %vm953_vm3, %v1111_v62, 0.0 }
 0x257   : > { %v1134_v54 = vsel %vm953_vm3, %v1112_v16, 0.0  ;;  %v1136_v61 = vsel %vm953_vm3, %v1113_v21, 0.0  ;;  %v1138_v38 = vsel %vm953_vm3, %v1114_v36, 0.0  ;;  %v1140_v3 = vsel %vm953_vm3, %v2530_v11, 0.0 }
 0x258   : > { %v1125_v19 = vadd.f32 %v1124_v32, %v1123_v63  ;;  %v1142_v55 = vsel %vm953_vm3, %v2532_v12, 0.0  ;;  %v1144_v8 = vsel %vm953_vm3, %v2536_v47, 0.0  ;;  %v1146_v45 = vsel %vm953_vm3, %v2538_v18, 0.0 }
 0x259   : > { %v1148_v58 = vsel %vm953_vm3, %v2540_v59, 0.0  ;;  %v1150_v43 = vsel %vm953_vm3, %v2542_v24, 0.0 }
 0x25a   : > { %v1127_v26 = vadd.f32 %v1126_v40, %v1125_v19 }
 0x25c   : > { %v1129_v27 = vadd.f32 %v1128_v17, %v1127_v26 }
 0x25e   : > { %v1131_v30 = vadd.f32 %v1130_v29, %v1129_v27 }
 0x260   : > { %v1133_v14 = vadd.f32 %v1132_v31, %v1131_v30 }
 0x262   : > { %v1135_v34 = vadd.f32 %v1134_v54, %v1133_v14 }
 0x264   : > { %v1137_v37 = vadd.f32 %v1136_v61, %v1135_v34 }
 0x266   : > { %v1139_v39 = vadd.f32 %v1138_v38, %v1137_v37 }
 0x268   : > { %v1141_v20 = vadd.f32 %v1140_v3, %v1139_v39 }
 0x26a   : > { %v1143_v41 = vadd.f32 %v1142_v55, %v1141_v20 }
 0x26c   : > { %v1145_v23 = vadd.f32 %v1144_v8, %v1143_v41 }
 0x26e   : > { %v1147_v9 = vadd.f32 %v1146_v45, %v1145_v23 }
 0x270   : > { %v1149_v25 = vadd.f32 %v1148_v58, %v1147_v9 }
 0x272   : > { %v1151_v15 = vadd.f32 %v1150_v43, %v1149_v25 }
 0x274   : > { %v1152_v51 = vrot.slane %v1151_v15, 4 }
 0x276   : > { %v1153_v52 = vadd.f32 %v1152_v51, %v1151_v15 }
 0x278   : > { %v1154_v49 = vrot.slane %v1153_v52, 2 }
 0x27a   : > { %v1155_v46 = vadd.f32 %v1154_v49, %v1153_v52 }
 0x27c   : > { %v1156_v50 = vrot.slane %v1155_v46, 1 }
 0x27e   : > { %v1157_v44 = vadd.f32 %v1156_v50, %v1155_v46 }
 0x280   : > { %v1158_v2 = vmul.f32 0.0078125, %v1157_v44 }
 0x282   : > { %v2575_v0 = vsub.f32 %v1105_v35, %v1158_v2  ;;  %v2577_v4 = vsub.f32 %v1106_v7, %v1158_v2  ;;  %v2579_v33 = vsub.f32 %v1107_v53, %v1158_v2  ;;  %v2581_v6 = vsub.f32 %v1108_v48, %v1158_v2 }
 0x283   : > { %v2583_v10 = vsub.f32 %v1109_v60, %v1158_v2  ;;  %v2585_v13 = vsub.f32 %v1110_v56, %v1158_v2  ;;  %v2587_v5 = vsub.f32 %v1111_v62, %v1158_v2  ;;  %v2589_v57 = vsub.f32 %v1112_v16, %v1158_v2 }
 0x284   : > { %v2591_v63 = vsub.f32 %v1113_v21, %v1158_v2  ;;  %v2593_v32 = vsub.f32 %v1114_v36, %v1158_v2  ;;  %v2596_v35 = vsub.f32 %v2530_v11, %v1158_v2  ;;  %v2599_v7 = vsub.f32 %v2532_v12, %v1158_v2 }
 0x285   : > { %v2602_v53 = vsub.f32 %v2536_v47, %v1158_v2  ;;  %v2605_v48 = vsub.f32 %v2538_v18, %v1158_v2  ;;  %v2608_v60 = vsub.f32 %v2540_v59, %v1158_v2  ;;  %v2611_v56 = vsub.f32 %v2542_v24, %v1158_v2 }
 0x286   : > { %v1175_v62 = vmul.f32 %v2575_v0, %v2575_v0  ;;  %v1176_v11 = vmul.f32 %v2577_v4, %v2577_v4  ;;  %v1177_v12 = vmul.f32 %v2579_v33, %v2579_v33  ;;  %v1178_v47 = vmul.f32 %v2581_v6, %v2581_v6 }
 0x287   : > { %v1179_v24 = vmul.f32 %v2583_v10, %v2583_v10  ;;  %v1180_v19 = vmul.f32 %v2585_v13, %v2585_v13  ;;  %v1181_v22 = vmul.f32 %v2587_v5, %v2587_v5  ;;  %v1182_v28 = vmul.f32 %v2589_v57, %v2589_v57 }
 0x288   : > { %v1191_v18 = vsel %vm953_vm3, %v1175_v62, 0.0  ;;  %v1192_v59 = vsel %vm953_vm3, %v1176_v11, 0.0  ;;  %v1194_v21 = vsel %vm953_vm3, %v1177_v12, 0.0  ;;  %v1196_v40 = vsel %vm953_vm3, %v1178_v47, 0.0 }
 0x289   : > { %v1193_v16 = vadd.f32 %v1192_v59, %v1191_v18  ;;  %v1198_v17 = vsel %vm953_vm3, %v1179_v24, 0.0  ;;  %v1200_v29 = vsel %vm953_vm3, %v1180_v19, 0.0  ;;  %v1183_v31 = vmul.f32 %v2591_v63, %v2591_v63 }
 0x28a   : > { %v1202_v14 = vsel %vm953_vm3, %v1181_v22, 0.0  ;;  %v1184_v34 = vmul.f32 %v2593_v32, %v2593_v32  ;;  %v1204_v61 = vsel %vm953_vm3, %v1182_v28, 0.0  ;;  %v1185_v38 = vmul.f32 %v2596_v35, %v2596_v35 }
 0x28b   : > { %v1195_v36 = vadd.f32 %v1194_v21, %v1193_v16  ;;  %v1206_v39 = vsel %vm953_vm3, %v1183_v31, 0.0  ;;  %v1186_v20 = vmul.f32 %v2599_v7, %v2599_v7  ;;  %v1187_v8 = vmul.f32 %v2602_v53, %v2602_v53 }
 0x28c   : > { %v1208_v55 = vsel %vm953_vm3, %v1184_v34, 0.0  ;;  %v1210_v23 = vsel %vm953_vm3, %v1185_v38, 0.0  ;;  %v1188_v9 = vmul.f32 %v2605_v48, %v2605_v48  ;;  %v1189_v43 = vmul.f32 %v2608_v60, %v2608_v60 }
 0x28d   : > { %v1197_v26 = vadd.f32 %v1196_v40, %v1195_v36  ;;  %v1212_v58 = vsel %vm953_vm3, %v1186_v20, 0.0  ;;  %v1214_v15 = vsel %vm953_vm3, %v1187_v8, 0.0  ;;  %v1190_v52 = vmul.f32 %v2611_v56, %v2611_v56 }
 0x28e   : > { %v1216_v49 = vsel %vm953_vm3, %v1188_v9, 0.0  ;;  %v1218_v50 = vsel %vm953_vm3, %v1189_v43, 0.0  ;;  %v1249_v36 = vsub.s32 4, %v2155_v1  ;;  %v1269_v19 = vsub.s32 5, %v2155_v1 }
 0x28f   : > { %v1199_v27 = vadd.f32 %v1198_v17, %v1197_v26  ;;  %v1220_v2 = vsel %vm953_vm3, %v1190_v52, 0.0  ;;  %v1289_v26 = vsub.s32 6, %v2155_v1 }
 0x290   : > { %v2664_v40 = vrot.slane %v2317_v42, %v1249_v36  ;;  %v2670_v17 = vrot.slane %v2317_v42, %v1269_v19 }
 0x291   : > { %v1201_v30 = vadd.f32 %v1200_v29, %v1199_v27 }
 0x293   : > { %v1203_v54 = vadd.f32 %v1202_v14, %v1201_v30 }
 0x295   : > { %v1205_v37 = vadd.f32 %v1204_v61, %v1203_v54  ;;  %v2690_v54 = vrot.slane %v2317_v42, %v1289_v26 }
 0x297   : > { %v1207_v3 = vadd.f32 %v1206_v39, %v1205_v37 }
 0x299   : > { %v1209_v41 = vadd.f32 %v1208_v55, %v1207_v3 }
 0x29b   : > { %v1211_v45 = vadd.f32 %v1210_v23, %v1209_v41 }
 0x29d   : > { %v1213_v25 = vadd.f32 %v1212_v58, %v1211_v45 }
 0x29f   : > { %v1215_v51 = vadd.f32 %v1214_v15, %v1213_v25 }
 0x2a1   : > { %v1217_v46 = vadd.f32 %v1216_v49, %v1215_v51 }
 0x2a3   : > { %v1219_v44 = vadd.f32 %v1218_v50, %v1217_v46 }
 0x2a5   : > { %v1221_v62 = vadd.f32 %v1220_v2, %v1219_v44 }
 0x2a7   : > { %v1222_v11 = vrot.slane %v1221_v62, 4 }
 0x2a9   : > { %v1223_v12 = vadd.f32 %v1222_v11, %v1221_v62 }
 0x2ab   : > { %v1224_v47 = vrot.slane %v1223_v12, 2 }
 0x2ad   : > { %v1225_v18 = vadd.f32 %v1224_v47, %v1223_v12 }
 0x2af   : > { %v1226_v59 = vrot.slane %v1225_v18, 1 }
 0x2b1   : > { %v1227_v16 = vadd.f32 %v1226_v59, %v1225_v18 }
 0x2b3   : > { %v1228_v24 = vmul.f32 0.0078125, %v1227_v16 }
 0x2b5   : > { %v1229_v21 = vadd.f32 1e-05, %v1228_v24 }
 0x2b7   : > { %1761 = vrsqrt.f32 %v1229_v21 }
 0x2c1   : > { %v2667_v22 = vpop.eup %1761 }
 0x2c2   : > { %v1231_v27 = vmul.f32 %v2667_v22, %v2575_v0  ;;  %v1232_v28 = vmul.f32 %v2667_v22, %v2577_v4  ;;  %v1233_v29 = vmul.f32 %v2667_v22, %v2579_v33  ;;  %v1234_v30 = vmul.f32 %v2667_v22, %v2581_v6 }
 0x2c3   : > { %v1235_v1 = vmul.f32 %v2667_v22, %v2583_v10  ;;  %v1236_v31 = vmul.f32 %v2667_v22, %v2585_v13  ;;  %v1237_v14 = vmul.f32 %v2667_v22, %v2587_v5  ;;  %v1238_v0 = vmul.f32 %v2667_v22, %v2589_v57 }
 0x2c4   : > { %v1251_v4 = vmul.f32 %v2664_v40, %v1231_v27  ;;  %v1252_v33 = vmul.f32 %v2664_v40, %v1232_v28  ;;  %v1253_v13 = vmul.f32 %v2664_v40, %v1233_v29  ;;  %v1254_v61 = vmul.f32 %v2664_v40, %v1234_v30 }
 0x2c5   : > { %v1255_v38 = vmul.f32 %v2664_v40, %v1235_v1  ;;  %v1256_v20 = vmul.f32 %v2664_v40, %v1236_v31  ;;  %v1257_v8 = vmul.f32 %v2664_v40, %v1237_v14  ;;  %v1258_v9 = vmul.f32 %v2664_v40, %v1238_v0 }
 0x2c6   : > { %v1271_v6 = vadd.f32 %v2670_v17, %v1251_v4  ;;  %v1272_v34 = vadd.f32 %v2670_v17, %v1252_v33  ;;  %v1273_v57 = vadd.f32 %v2670_v17, %v1253_v13  ;;  %v1274_v37 = vadd.f32 %v2670_v17, %v1254_v61 }
 0x2c7   : > { %v1275_v3 = vadd.f32 %v2670_v17, %v1255_v38  ;;  %v1276_v41 = vadd.f32 %v2670_v17, %v1256_v20  ;;  %v1277_v45 = vadd.f32 %v2670_v17, %v1257_v8  ;;  %v1239_v58 = vmul.f32 %v2667_v22, %v2591_v63 }
 0x2c8   : > { %v1291_v10 = vmul.f32 %v2690_v54, %v1271_v6  ;;  %v1292_v5 = vmul.f32 %v2690_v54, %v1272_v34  ;;  %v1293_v42 = vmul.f32 %v2690_v54, %v1273_v57  ;;  %v1294_v39 = vmul.f32 %v2690_v54, %v1274_v37  ;;  %v1348_v6 = vpop.permute.xlu0 %1347 }
 0x2c9   : > { %v1295_v55 = vmul.f32 %v2690_v54, %v1275_v3  ;;  %v1296_v23 = vmul.f32 %v2690_v54, %v1276_v41  ;;  %v1297_v25 = vmul.f32 %v2690_v54, %v1277_v45  ;;  %v1278_v43 = vadd.f32 %v2670_v17, %v1258_v9 }
 0x2ca   : > { %1307 = vxpose.xlu1.b32.start [1/16] (narrow) %v1291_v10, 8  ;;  %v1259_v15 = vmul.f32 %v2664_v40, %v1239_v58  ;;  %v1240_v51 = vmul.f32 %v2667_v22, %v2593_v32  ;;  %v1241_v63 = vmul.f32 %v2667_v22, %v2596_v35  ;;  %v1242_v32 = vmul.f32 %v2667_v22, %v2599_v7 }
 0x2cb   : > { %v1298_v52 = vmul.f32 %v2690_v54, %v1278_v43  ;;  %v1243_v35 = vmul.f32 %v2667_v22, %v2602_v53  ;;  %v1244_v7 = vmul.f32 %v2667_v22, %v2605_v48  ;;  %v1245_v53 = vmul.f32 %v2667_v22, %v2608_v60 }
 0x2cc   : > { %v1279_v49 = vadd.f32 %v2670_v17, %v1259_v15  ;;  %v1260_v46 = vmul.f32 %v2664_v40, %v1240_v51  ;;  %v1261_v2 = vmul.f32 %v2664_v40, %v1241_v63  ;;  %v1262_v12 = vmul.f32 %v2664_v40, %v1242_v32 }
 0x2cd   : > { %v1263_v59 = vmul.f32 %v2664_v40, %v1243_v35  ;;  %v1264_v21 = vmul.f32 %v2664_v40, %v1244_v7  ;;  %v1265_v26 = vmul.f32 %v2664_v40, %v1245_v53  ;;  %v1246_v48 = vmul.f32 %v2667_v22, %v2611_v56 }
 0x2ce   : > { %1308 = vxpose.xlu1.b32.cont [2/16] (narrow) %v1292_v5, 8  ;;  %v1299_v50 = vmul.f32 %v2690_v54, %v1279_v49  ;;  %v1280_v44 = vadd.f32 %v2670_v17, %v1260_v46  ;;  %v1281_v11 = vadd.f32 %v2670_v17, %v1261_v2  ;;  %v1282_v18 = vadd.f32 %v2670_v17, %v1262_v12 }
 0x2cf   : > { %v1283_v24 = vadd.f32 %v2670_v17, %v1263_v59  ;;  %v1284_v19 = vadd.f32 %v2670_v17, %v1264_v21  ;;  %v1285_v28 = vadd.f32 %v2670_v17, %v1265_v26  ;;  %v1266_v29 = vmul.f32 %v2664_v40, %v1246_v48 }
 0x2d0   : > { %v1300_v62 = vmul.f32 %v2690_v54, %v1280_v44  ;;  %v1301_v47 = vmul.f32 %v2690_v54, %v1281_v11  ;;  %v1302_v16 = vmul.f32 %v2690_v54, %v1282_v18 }
 0x2d1   : > { %v1303_v36 = vmul.f32 %v2690_v54, %v1283_v24  ;;  %v1304_v27 = vmul.f32 %v2690_v54, %v1284_v19  ;;  %v1305_v60 = vmul.f32 %v2690_v54, %v1285_v28  ;;  %v1286_v30 = vadd.f32 %v2670_v17, %v1266_v29 }
 0x2d2   : > { %1309 = vxpose.xlu1.b32.cont [3/16] (narrow) %v1293_v42, 8 }
 0x2d3   : > { %v1306_v1 = vmul.f32 %v2690_v54, %v1286_v30  ;;  %v1360_v54 = vpop.permute.xlu0 %1359 }
 0x2d4   : > { %v1361_v13 = vrot.slane %v1360_v54, 1 }
 0x2d6   : > { %1310 = vxpose.xlu1.b32.cont [4/16] (narrow) %v1294_v39, 8 }
 0x2da   : > { %1311 = vxpose.xlu1.b32.cont [5/16] (narrow) %v1295_v55, 8 }
 0x2de   : > { %1312 = vxpose.xlu1.b32.cont [6/16] (narrow) %v1296_v23, 8 }
 0x2e2   : > { %1313 = vxpose.xlu1.b32.cont [7/16] (narrow) %v1297_v25, 8 }
 0x2e6   : > { %1314 = vxpose.xlu1.b32.cont [8/16] (narrow) %v1298_v52, 8 }
 0x2ea   : > { %1315 = vxpose.xlu1.b32.cont [9/16] (narrow) %v1299_v50, 8 }
 0x2ee   : > { %1316 = vxpose.xlu1.b32.cont [10/16] (narrow) %v1300_v62, 8 }
 0x2f2   : > { %1317 = vxpose.xlu1.b32.cont [11/16] (narrow) %v1301_v47, 8 }
 0x2f6   : > { %1318 = vxpose.xlu1.b32.cont [12/16] (narrow) %v1302_v16, 8 }
 0x2fa   : > { %1319 = vxpose.xlu1.b32.cont [13/16] (narrow) %v1303_v36, 8 }
 0x2fe   : > { %1320 = vxpose.xlu1.b32.cont [14/16] (narrow) %v1304_v27, 8 }
 0x302   : > { %1321 = vxpose.xlu1.b32.cont [15/16] (narrow) %v1305_v60, 8 }
 0x306   : > { %1322 = vxpose.xlu1.b32.end [16/16] (narrow) %v1306_v1, 8 }
 0x34a   : > { %v1323_v31 = vpop.trf.xlu1 }
 0x34b   : > { %v1339_v14 = vrot.slane %v1323_v31, 4 }
 0x34d   : > { %v1340_v56 = vadd.f32 %v1339_v14, %v1323_v31 }
 0x34f   : > { %v1341_v22 = vrot.slane %v1340_v56, 2 }
 0x351   : > { %v1342_v0 = vadd.f32 %v1341_v22, %v1340_v56 }
 0x353   : > { %v1343_v4 = vrot.slane %v1342_v0, 1 }
 0x355   : > { %v1344_v33 = vadd.f32 %v1343_v4, %v1342_v0 }
 0x357   : > { %v1350_v40 = vadd.f32 %v1348_v6, %v1344_v33 }
 0x359   : > { %v1455_v10 = vmul.f32 -1.442695, %v1350_v40 }
 0x35b   : > { %1763 = vpow2.f32 %v1455_v10 }
 0x365   : > { %v1764_v34 = vpop.eup %1763 }
 0x366   : > { %v1354_v17 = vadd.f32 1.0, %v1764_v34 }
 0x368   : > { %1765 = vrcp.f32 %v1354_v17 }
 0x372   : > { %v1766_v5 = vpop.eup %1765 }
 0x373   : > { %v1363_v57 = vmul.f32 %v1766_v5, %v1361_v13 }
 0x375   : > { %1364 = vst [vmem:[%s190_s29 - $0x7] sm:$0x80] %v1363_v57 }
 0x376   : > { %1780 = shalt.err (!%p1777_p3)
}
 0x377   : > { %s1781_s27 = scalar_lea.hbm %s2760_s7, 16  ;;  %s1785_s23 = scalar_lea.hbm %s2806_s4, 32 }
 0x378   : > { %p1782_p4 = scmp.ne.s32.totalorder %s2760_s7, %s1781_s27  ;;  %p1786_p9 = scmp.lt.u32.totalorder %s2760_s7, %s2806_s4 }
 0x379   : > { %p1787_p10 = scmp.lt.u32.totalorder %s1785_s23, %s1781_s27  ;;  %p1789_p12 = scmp.lt.u32.totalorder %s1781_s27, %s2760_s7 }
 0x37a   : > { %p1783_p7 = pnand %p1782_p4, %p1896_p5 }
 0x37b   : > { %p1788_p11 = por %p1787_p10, %p1786_p9 }
 0x37c   : > { %p1784_p8 = pneg %p1783_p7 }
 0x37d   : > { %p1790_p13 = por %p1789_p12, %p1788_p11 }
 0x37f   : > { %p1791_p0 = pnand %p1790_p13, %p1784_p8 }
 0x381   : > { %1794 = shalt.err (!%p1791_p0)
}
 0x382   : > { %1587 = dma.vmem_to_hbm [thread:$0]  (%p1896_p5), %s2762_s30, 16, %s2760_s7, %s1366_s8  }
 0x383 PF: > { %p1593_p1 = scmp.ge.s32.totalorder %s1829_s18, 2  ;;  %s1390_s20 = sand.u32 1, %s1817_s15  }
 0x384   : > { %s1391_s22 = scalar_lea.sflag [#allocation3], %s1390_s20 }
 0x385   : > { %p1590_p2 = pnand %p1593_p1, %p1900_p6 }
 0x387   : > { %1812 = dma.done.wait (!%p1590_p2), %s1391_s22, 16  }
 0x388   : > { %1814 = vsyncadd (!%p1590_p2), %s1391_s22, 4294967280  ;;  %p14_p3 = scmp.ge.s32.totalorder %s1884_s21, 4   ;;  %s2809_s15 = smov %s1821_s16 }
 0x389   : > { %s2810_s16 = smov %s1825_s17  ;;  %s2811_s17 = smov %s1894_s24 }
 0x38a   : > { %s2812_s18 = smov %s1884_s21  ;;  %16 = sbr.rel (!%p14_p3) target bundleno = 3 (0x3), region = 71 }
 0x391   :  { %1395 = vsyncpa [#allocation3], 1 }
 0x392   :  { %1397 = vsyncpa [#allocation3 + $0x1], 1 }

</bundles_post_ra>
